<compile_context>
chip_gen: v7x
topology: tpu7x:2x2x1
jax: 0.10.0
libtpu: 0.0.40
codegen_flags: <defaults>
</compile_context>

<pallas_src>
import functools
import math

import jax
import jax.numpy as jnp
from jax.experimental import pallas as pl
from jax.experimental.pallas import tpu as pltpu


_INV_SQRT2 = 1.0 / math.sqrt(2.0)


def _gelu_exact(x):
    # torch.nn.GELU() default = exact erf formulation (done in f32).
    return 0.5 * x * (1.0 + jax.lax.erf(x * _INV_SQRT2))


def _round_up(v, m):
    return ((v + m - 1) // m) * m


# ------------------------------- kernels ------------------------------------


def mlp_kernel_fused(x_ref, w1_ref, b1_ref, w2_ref, b2_ref, o_ref):
    """Fast path: one grid step per row tile, all weights resident in VMEM."""
    h = jnp.dot(x_ref[...], w1_ref[...], preferred_element_type=jnp.float32)
    h = _gelu_exact(h + b1_ref[...]).astype(w2_ref.dtype)
    out = jnp.dot(h, w2_ref[...], preferred_element_type=jnp.float32)
    o_ref[...] = (out + b2_ref[...]).astype(o_ref.dtype)


def mlp_kernel_tiled(x_ref, w1_ref, b1_ref, w2_ref, b2_ref, o_ref, h_ref):
    """Tiled path: output columns tiled; GELU activations cached at j == 0."""
    j = pl.program_id(1)

    # Hidden activations depend only on the row tile (grid axis 0): compute
    # them once (first column tile) into VMEM scratch in the matmul dtype and
    # reuse for the remaining column tiles of this row tile.
    @pl.when(j == 0)
    def _():
        h = jnp.dot(x_ref[...], w1_ref[...], preferred_element_type=jnp.float32)
        h_ref[...] = _gelu_exact(h + b1_ref[...]).astype(h_ref.dtype)

    out = jnp.dot(h_ref[...], w2_ref[...], preferred_element_type=jnp.float32)
    o_ref[...] = (out + b2_ref[...]).astype(o_ref.dtype)


# ------------------------------- wrapper ------------------------------------


def _vmem_physical_bytes():
    try:
        info = pltpu.get_tpu_info()
        for attr in ("vmem_capacity_bytes", "vmem_bytes", "vmem_size_bytes"):
            cap = getattr(info, attr, None)
            if cap:
                return int(cap)
    except Exception:
        pass
    return 64 * 1024 * 1024  # conservative default: v7x per-core VMEM


def _vmem_estimate(tm, tn, n_tiles, in_dim, hidden, ci, oi, single_buf_invariant):
    """Rough VMEM footprint of one pipelined kernel instance (bytes)."""
    inv_bufs = 1 if single_buf_invariant else 2
    w2_bufs = inv_bufs if n_tiles == 1 else 2
    est = (2 * tm * in_dim * ci               # x row tile (double buffered)
           + inv_bufs * in_dim * hidden * ci  # W1 (grid-invariant)
           + inv_bufs * hidden * 4            # b1 (f32)
           + w2_bufs * hidden * tn * ci       # W2 (tile)
           + w2_bufs * tn * 4                 # b2 (f32)
           + 2 * tm * tn * oi)                # output tile (double buffered)
    if n_tiles > 1:
        est += tm * hidden * ci               # GELU-activation scratch
    return est


def mlp_pallas(x, w1, b1, w2, b2, *, compute_dtype=jnp.bfloat16,
               tile_budget_bytes=None):
    """Fused MLP forward applied along the last dim of x.

    x: (..., in_dim); w1: (in_dim, hidden); b1: (hidden,) or (1, hidden);
    w2: (hidden, out_dim); b2: (out_dim,) or (1, out_dim).
    Returns (..., out_dim) in x.dtype.  Matmuls run in compute_dtype with f32
    accumulation; bias + GELU are done in f32.
    """
    in_dim = x.shape[-1]
    hidden = w1.shape[1]
    out_dim = w2.shape[1]
    lead = x.shape[:-1]
    M = int(math.prod(lead)) if lead else 1
    out_dtype = x.dtype

    ci = jnp.dtype(compute_dtype).itemsize
    oi = jnp.dtype(out_dtype).itemsize

    phys_vmem = _vmem_physical_bytes()
    vmem_limit = int(phys_vmem * 0.85)
    if tile_budget_bytes is None:
        tile_budget_bytes = int(vmem_limit * 0.75)

    out_dim_p = _round_up(out_dim, 128)   # lane-dense output stores

    est = functools.partial(_vmem_estimate, in_dim=in_dim, hidden=hidden,
                            ci=ci, oi=oi, single_buf_invariant=True)

    # ---- tile selection ------------------------------------------------
    tm = 256 if M >= 256 else _round_up(M, 8)
    tn = None
    n_tiles = None
    while True:
        # Fast path: whole padded out_dim as a single column tile.
        if est(tm, out_dim_p, 1) <= tile_budget_bytes:
            tn, n_tiles = out_dim_p, 1
            break
        q = out_dim_p // 128
        found = False
        for d in range(q - 1, 0, -1):     # largest 128-multiple divisor first
            if q % d:
                continue
            cand = 128 * d
            if est(tm, cand, q // d) <= tile_budget_bytes:
                tn, n_tiles = cand, q // d
                found = True
                break
        if found:
            break
        if tm > 128:
            tm = max(128, tm // 2)
            continue
        tn, n_tiles = 128, q              # best effort
        break
    # TODO(synk): for very large in_dim, add a K-reduction grid axis over W1
    # rows with an f32 accumulator (pl.when init/finalize) to bound W1's VMEM
    # footprint instead of only shrinking tm/tn.

    m_tiles = pl.cdiv(M, tm)
    M_pad = m_tiles * tm

    # ---- operand preparation --------------------------------------------
    x2 = x.reshape(M, in_dim).astype(compute_dtype)
    if M_pad != M:
        # TODO(synk): for very large M, replace this wrapper pad (extra HBM
        # pass over x) with a smaller/masked final row tile inside the kernel.
        x2 = jnp.pad(x2, ((0, M_pad - M), (0, 0)))
    w1c = w1.astype(compute_dtype)
    b1c = jnp.reshape(b1, (1, hidden)).astype(jnp.float32)
    w2c = w2.astype(compute_dtype)
    b2c = jnp.reshape(b2, (1, out_dim)).astype(jnp.float32)
    if out_dim_p != out_dim:
        w2c = jnp.pad(w2c, ((0, 0), (0, out_dim_p - out_dim)))
        b2c = jnp.pad(b2c, ((0, 0), (0, out_dim_p - out_dim)))

    # ---- cost estimate (W2 re-streamed m_tiles times on the tiled path) --
    flops = 2 * M_pad * in_dim * hidden + 2 * M_pad * hidden * out_dim_p
    transcendentals = M_pad * hidden
    w2_streams = 1 if n_tiles == 1 else m_tiles
    bytes_accessed = (M_pad * in_dim * ci
                      + in_dim * hidden * ci + hidden * 4
                      + w2_streams * (hidden * out_dim_p * ci + out_dim_p * 4)
                      + M_pad * out_dim_p * oi)
    cost = pl.CostEstimate(flops=flops, transcendentals=transcendentals,
                           bytes_accessed=bytes_accessed)

    # ---- pallas_call construction ----------------------------------------
    def build(single_buffer_invariant):
        inv_mode = {}
        if single_buffer_invariant:
            # Grid-invariant blocks never re-DMA: one pipeline buffer suffices.
            inv_mode = dict(pipeline_mode=pl.Buffered(1))

        if n_tiles == 1:
            grid = (m_tiles,)
            in_specs = [
                pl.BlockSpec((tm, in_dim), lambda i: (i, 0)),
                pl.BlockSpec((in_dim, hidden), lambda i: (0, 0), **inv_mode),
                pl.BlockSpec((1, hidden), lambda i: (0, 0), **inv_mode),
                pl.BlockSpec((hidden, out_dim_p), lambda i: (0, 0), **inv_mode),
                pl.BlockSpec((1, out_dim_p), lambda i: (0, 0), **inv_mode),
            ]
            out_specs = pl.BlockSpec((tm, out_dim_p), lambda i: (i, 0))
            scratch = []
            kernel = mlp_kernel_fused
            dims = ("parallel",)
        else:
            grid = (m_tiles, n_tiles)
            in_specs = [
                pl.BlockSpec((tm, in_dim), lambda i, j: (i, 0)),
                pl.BlockSpec((in_dim, hidden), lambda i, j: (0, 0), **inv_mode),
                pl.BlockSpec((1, hidden), lambda i, j: (0, 0), **inv_mode),
                pl.BlockSpec((hidden, tn), lambda i, j: (0, j)),
                pl.BlockSpec((1, tn), lambda i, j: (0, j)),
            ]
            out_specs = pl.BlockSpec((tm, tn), lambda i, j: (i, j))
            scratch = [pltpu.VMEM((tm, hidden), compute_dtype)]
            kernel = mlp_kernel_tiled
            # Column axis carries the scratch dependency: keep it "arbitrary".
            dims = ("parallel", "arbitrary")

        return pl.pallas_call(
            kernel,
            out_shape=jax.ShapeDtypeStruct((M_pad, out_dim_p), out_dtype),
            grid_spec=pltpu.PrefetchScalarGridSpec(
                num_scalar_prefetch=0,
                grid=grid,
                in_specs=in_specs,
                out_specs=out_specs,
                scratch_shapes=scratch,
            ),
            compiler_params=pltpu.CompilerParams(
                dimension_semantics=dims,
                vmem_limit_bytes=vmem_limit,
            ),
            cost_estimate=cost,
        )

    args = (x2, w1c, b1c, w2c, b2c)
    try:
        out = build(True)(*args)
    except Exception:
        # pl.Buffered(1) rejected by this jax/Mosaic version: fall back to
        # default double-buffering of the grid-invariant weights.
        out = build(False)(*args)

    out = out[:M, :out_dim]
    return out.reshape(*lead, out_dim)


def reference_mlp(x, w1, b1, w2, b2):
    h = x @ w1 + b1
    h = _gelu_exact(h)
    return h @ w2 + b2


if __name__ == "__main__":
    key = jax.random.PRNGKey(0)
    k_x, k_w1, k_b1, k_w2, k_b2 = jax.random.split(key, 5)

    # Small shapes consistent with MLP(input_dim, output_dim):
    # (batch, seq, in_dim) -> (batch, seq, out_dim).
    batch, seq = 2, 100
    input_dim, output_dim = 128, 256

    x = jax.random.normal(k_x, (batch, seq, input_dim), dtype=jnp.float32)

    # Deterministic parameter init (uniform, like PyTorch's default Linear).
    lim1 = 1.0 / math.sqrt(input_dim)
    lim2 = 1.0 / math.sqrt(output_dim)
    w1 = jax.random.uniform(k_w1, (input_dim, output_dim), jnp.float32, -lim1, lim1)
    b1 = jax.random.uniform(k_b1, (output_dim,), jnp.float32, -lim1, lim1)
    w2 = jax.random.uniform(k_w2, (output_dim, output_dim), jnp.float32, -lim2, lim2)
    b2 = jax.random.uniform(k_b2, (output_dim,), jnp.float32, -lim2, lim2)

    ref = reference_mlp(x, w1, b1.reshape(1, -1), w2, b2.reshape(1, -1))

    # 1) Default: bf16 MXU matmuls with f32 accumulation, single-step fast path.
    out_bf16 = jax.block_until_ready(mlp_pallas(x, w1, b1, w2, b2))
    assert out_bf16.shape == (batch, seq, output_dim)
    assert jnp.allclose(out_bf16, ref, atol=2e-2, rtol=2e-2), "bf16 path mismatch"

    # 2) Tiny tile budget to exercise the output-column-tiled (scratch) path.
    out_tiled = jax.block_until_ready(
        mlp_pallas(x, w1, b1, w2, b2, tile_budget_bytes=620_000))
    assert out_tiled.shape == (batch, seq, output_dim)
    assert jnp.allclose(out_tiled, ref, atol=2e-2, rtol=2e-2), "tiled path mismatch"

    # 3) Full f32 compute for tight numerical parity with the torch module.
    out_f32 = jax.block_until_ready(
        mlp_pallas(x, w1, b1, w2, b2, compute_dtype=jnp.float32))
    assert jnp.allclose(out_f32, ref, atol=1e-4, rtol=1e-4), "f32 path mismatch"

    print("KERNEL_OK")
</pallas_src>

<mosaic_0001>
module attributes {stable_mosaic.version = 11 : i64} {
  func.func @mlp_kernel_fused(%arg0: i32, %arg1: memref<200x128xbf16, #tpu.memory_space<vmem>>, %arg2: memref<128x256xbf16, #tpu.memory_space<vmem>>, %arg3: memref<1x256xf32, #tpu.memory_space<vmem>>, %arg4: memref<256x256xbf16, #tpu.memory_space<vmem>>, %arg5: memref<1x256xf32, #tpu.memory_space<vmem>>, %arg6: memref<200x256xf32, #tpu.memory_space<vmem>>) attributes {dimension_semantics = [#tpu.dimension_semantics<parallel>], iteration_bounds = array<i64: 1>, scalar_prefetch = 0 : i64, scratch_operands = 0 : i64, tpu.core_type = #tpu.core_type<tc>, window_params = [{transform_indices = @transform_0, window_bounds = array<i64: 200, 128>}, {pipeline_mode = #tpu.pipeline_mode<synchronous>, transform_indices = @transform_1, window_bounds = array<i64: 128, 256>}, {pipeline_mode = #tpu.pipeline_mode<synchronous>, transform_indices = @transform_2, window_bounds = array<i64: 1, 256>}, {pipeline_mode = #tpu.pipeline_mode<synchronous>, transform_indices = @transform_3, window_bounds = array<i64: 256, 256>}, {pipeline_mode = #tpu.pipeline_mode<synchronous>, transform_indices = @transform_4, window_bounds = array<i64: 1, 256>}, {transform_indices = @transform_5, window_bounds = array<i64: 200, 256>}]} {
    %c0 = arith.constant 0 : index
    %c0_0 = arith.constant 0 : index
    %0 = vector.load %arg1[%c0, %c0_0] : memref<200x128xbf16, #tpu.memory_space<vmem>>, vector<200x128xbf16>
    %c0_1 = arith.constant 0 : index
    %c0_2 = arith.constant 0 : index
    %1 = vector.load %arg2[%c0_1, %c0_2] : memref<128x256xbf16, #tpu.memory_space<vmem>>, vector<128x256xbf16>
    %cst = arith.constant dense<0.000000e+00> : vector<200x256xf32>
    %2 = tpu.matmul %0, %1, %cst {dimension_numbers = #tpu.dot_dimension_numbers<[1], [0], [0], [1], [0, 0, 1, 1], [], []>} : vector<200x128xbf16>, vector<128x256xbf16>, vector<200x256xf32> -> vector<200x256xf32>
    %c0_3 = arith.constant 0 : index
    %c0_4 = arith.constant 0 : index
    %3 = vector.load %arg3[%c0_3, %c0_4] : memref<1x256xf32, #tpu.memory_space<vmem>>, vector<1x256xf32>
    %4 = vector.broadcast %3 : vector<1x256xf32> to vector<200x256xf32>
    %5 = arith.addf %2, %4 : vector<200x256xf32>
    %cst_5 = arith.constant 5.000000e-01 : f32
    %6 = vector.broadcast %cst_5 : f32 to vector<200x256xf32>
    %7 = arith.mulf %6, %5 : vector<200x256xf32>
    %cst_6 = arith.constant 0.707106769 : f32
    %8 = vector.broadcast %cst_6 : f32 to vector<200x256xf32>
    %9 = arith.mulf %5, %8 : vector<200x256xf32>
    %10 = math.erf %9 : vector<200x256xf32>
    %cst_7 = arith.constant 1.000000e+00 : f32
    %11 = vector.broadcast %cst_7 : f32 to vector<200x256xf32>
    %12 = arith.addf %11, %10 : vector<200x256xf32>
    %13 = arith.mulf %7, %12 : vector<200x256xf32>
    %14 = arith.truncf %13 : vector<200x256xf32> to vector<200x256xbf16>
    %c0_8 = arith.constant 0 : index
    %c0_9 = arith.constant 0 : index
    %15 = vector.load %arg4[%c0_8, %c0_9] : memref<256x256xbf16, #tpu.memory_space<vmem>>, vector<256x256xbf16>
    %cst_10 = arith.constant dense<0.000000e+00> : vector<200x256xf32>
    %16 = tpu.matmul %14, %15, %cst_10 {dimension_numbers = #tpu.dot_dimension_numbers<[1], [0], [0], [1], [0, 0, 1, 1], [], []>} : vector<200x256xbf16>, vector<256x256xbf16>, vector<200x256xf32> -> vector<200x256xf32>
    %c0_11 = arith.constant 0 : index
    %c0_12 = arith.constant 0 : index
    %17 = vector.load %arg5[%c0_11, %c0_12] : memref<1x256xf32, #tpu.memory_space<vmem>>, vector<1x256xf32>
    %18 = vector.broadcast %17 : vector<1x256xf32> to vector<200x256xf32>
    %19 = arith.addf %16, %18 : vector<200x256xf32>
    %c0_13 = arith.constant 0 : index
    %c0_14 = arith.constant 0 : index
    %20 = vector.load %arg6[%c0_13, %c0_14] : memref<200x256xf32, #tpu.memory_space<vmem>>, vector<200x256xf32>
    tpu.vector_store %arg6[%c0_13, %c0_14], %19 {strides = array<i32>} : memref<200x256xf32, #tpu.memory_space<vmem>>, vector<200x256xf32>,
    return
  }
  func.func @transform_0(%arg0: i32) -> (i32, i32) {
    %c0_i32 = arith.constant 0 : i32
    %c0_i32_0 = arith.constant 0 : i32
    return %arg0, %c0_i32 : i32, i32
  }
  func.func @transform_1(%arg0: i32) -> (i32, i32) {
    %c0_i32 = arith.constant 0 : i32
    %c0_i32_0 = arith.constant 0 : i32
    %c0_i32_1 = arith.constant 0 : i32
    return %c0_i32, %c0_i32_0 : i32, i32
  }
  func.func @transform_2(%arg0: i32) -> (i32, i32) {
    %c0_i32 = arith.constant 0 : i32
    %c0_i32_0 = arith.constant 0 : i32
    %c0_i32_1 = arith.constant 0 : i32
    return %c0_i32, %c0_i32_0 : i32, i32
  }
  func.func @transform_3(%arg0: i32) -> (i32, i32) {
    %c0_i32 = arith.constant 0 : i32
    %c0_i32_0 = arith.constant 0 : i32
    %c0_i32_1 = arith.constant 0 : i32
    return %c0_i32, %c0_i32_0 : i32, i32
  }
  func.func @transform_4(%arg0: i32) -> (i32, i32) {
    %c0_i32 = arith.constant 0 : i32
    %c0_i32_0 = arith.constant 0 : i32
    %c0_i32_1 = arith.constant 0 : i32
    return %c0_i32, %c0_i32_0 : i32, i32
  }
  func.func @transform_5(%arg0: i32) -> (i32, i32) {
    %c0_i32 = arith.constant 0 : i32
    %c0_i32_0 = arith.constant 0 : i32
    return %arg0, %c0_i32 : i32, i32
  }
}

module attributes {stable_mosaic.version = 11 : i64} {
  func.func @mlp_kernel_fused(%arg0: i32, %arg1: memref<200x128xbf16, #tpu.memory_space<vmem>>, %arg2: memref<128x256xbf16, #tpu.memory_space<vmem>>, %arg3: memref<1x256xf32, #tpu.memory_space<vmem>>, %arg4: memref<256x256xbf16, #tpu.memory_space<vmem>>, %arg5: memref<1x256xf32, #tpu.memory_space<vmem>>, %arg6: memref<200x256xf32, #tpu.memory_space<vmem>>) attributes {dimension_semantics = [#tpu.dimension_semantics<parallel>], iteration_bounds = array<i64: 1>, scalar_prefetch = 0 : i64, scratch_operands = 0 : i64, tpu.core_type = #tpu.core_type<tc>, window_params = [{transform_indices = @transform_0, window_bounds = array<i64: 200, 128>}, {pipeline_mode = #tpu.pipeline_mode<synchronous>, transform_indices = @transform_1, window_bounds = array<i64: 128, 256>}, {pipeline_mode = #tpu.pipeline_mode<synchronous>, transform_indices = @transform_2, window_bounds = array<i64: 1, 256>}, {pipeline_mode = #tpu.pipeline_mode<synchronous>, transform_indices = @transform_3, window_bounds = array<i64: 256, 256>}, {pipeline_mode = #tpu.pipeline_mode<synchronous>, transform_indices = @transform_4, window_bounds = array<i64: 1, 256>}, {transform_indices = @transform_5, window_bounds = array<i64: 200, 256>}]} {
    %c0 = arith.constant 0 : index
    %c0_0 = arith.constant 0 : index
    %0 = vector.load %arg1[%c0, %c0_0] : memref<200x128xbf16, #tpu.memory_space<vmem>>, vector<200x128xbf16>
    %c0_1 = arith.constant 0 : index
    %c0_2 = arith.constant 0 : index
    %1 = vector.load %arg2[%c0_1, %c0_2] : memref<128x256xbf16, #tpu.memory_space<vmem>>, vector<128x256xbf16>
    %cst = arith.constant dense<0.000000e+00> : vector<200x256xf32>
    %2 = tpu.matmul %0, %1, %cst {dimension_numbers = #tpu.dot_dimension_numbers<[1], [0], [0], [1], [0, 0, 1, 1], [], []>} : vector<200x128xbf16>, vector<128x256xbf16>, vector<200x256xf32> -> vector<200x256xf32>
    %c0_3 = arith.constant 0 : index
    %c0_4 = arith.constant 0 : index
    %3 = vector.load %arg3[%c0_3, %c0_4] : memref<1x256xf32, #tpu.memory_space<vmem>>, vector<1x256xf32>
    %4 = vector.broadcast %3 : vector<1x256xf32> to vector<200x256xf32>
    %5 = arith.addf %2, %4 : vector<200x256xf32>
    %cst_5 = arith.constant 5.000000e-01 : f32
    %6 = vector.broadcast %cst_5 : f32 to vector<200x256xf32>
    %7 = arith.mulf %6, %5 : vector<200x256xf32>
    %cst_6 = arith.constant 0.707106769 : f32
    %8 = vector.broadcast %cst_6 : f32 to vector<200x256xf32>
    %9 = arith.mulf %5, %8 : vector<200x256xf32>
    %10 = math.erf %9 : vector<200x256xf32>
    %cst_7 = arith.constant 1.000000e+00 : f32
    %11 = vector.broadcast %cst_7 : f32 to vector<200x256xf32>
    %12 = arith.addf %11, %10 : vector<200x256xf32>
    %13 = arith.mulf %7, %12 : vector<200x256xf32>
    %14 = arith.truncf %13 : vector<200x256xf32> to vector<200x256xbf16>
    %c0_8 = arith.constant 0 : index
    %c0_9 = arith.constant 0 : index
    %15 = vector.load %arg4[%c0_8, %c0_9] : memref<256x256xbf16, #tpu.memory_space<vmem>>, vector<256x256xbf16>
    %cst_10 = arith.constant dense<0.000000e+00> : vector<200x256xf32>
    %16 = tpu.matmul %14, %15, %cst_10 {dimension_numbers = #tpu.dot_dimension_numbers<[1], [0], [0], [1], [0, 0, 1, 1], [], []>} : vector<200x256xbf16>, vector<256x256xbf16>, vector<200x256xf32> -> vector<200x256xf32>
    %c0_11 = arith.constant 0 : index
    %c0_12 = arith.constant 0 : index
    %17 = vector.load %arg5[%c0_11, %c0_12] : memref<1x256xf32, #tpu.memory_space<vmem>>, vector<1x256xf32>
    %18 = vector.broadcast %17 : vector<1x256xf32> to vector<200x256xf32>
    %19 = arith.addf %16, %18 : vector<200x256xf32>
    %c0_13 = arith.constant 0 : index
    %c0_14 = arith.constant 0 : index
    %20 = vector.load %arg6[%c0_13, %c0_14] : memref<200x256xf32, #tpu.memory_space<vmem>>, vector<200x256xf32>
    tpu.vector_store %arg6[%c0_13, %c0_14], %19 {strides = array<i32>} : memref<200x256xf32, #tpu.memory_space<vmem>>, vector<200x256xf32>,
    return
  }
  func.func @transform_0(%arg0: i32) -> (i32, i32) {
    %c0_i32 = arith.constant 0 : i32
    %c0_i32_0 = arith.constant 0 : i32
    return %arg0, %c0_i32 : i32, i32
  }
  func.func @transform_1(%arg0: i32) -> (i32, i32) {
    %c0_i32 = arith.constant 0 : i32
    %c0_i32_0 = arith.constant 0 : i32
    %c0_i32_1 = arith.constant 0 : i32
    return %c0_i32, %c0_i32_0 : i32, i32
  }
  func.func @transform_2(%arg0: i32) -> (i32, i32) {
    %c0_i32 = arith.constant 0 : i32
    %c0_i32_0 = arith.constant 0 : i32
    %c0_i32_1 = arith.constant 0 : i32
    return %c0_i32, %c0_i32_0 : i32, i32
  }
  func.func @transform_3(%arg0: i32) -> (i32, i32) {
    %c0_i32 = arith.constant 0 : i32
    %c0_i32_0 = arith.constant 0 : i32
    %c0_i32_1 = arith.constant 0 : i32
    return %c0_i32, %c0_i32_0 : i32, i32
  }
  func.func @transform_4(%arg0: i32) -> (i32, i32) {
    %c0_i32 = arith.constant 0 : i32
    %c0_i32_0 = arith.constant 0 : i32
    %c0_i32_1 = arith.constant 0 : i32
    return %c0_i32, %c0_i32_0 : i32, i32
  }
  func.func @transform_5(%arg0: i32) -> (i32, i32) {
    %c0_i32 = arith.constant 0 : i32
    %c0_i32_0 = arith.constant 0 : i32
    return %arg0, %c0_i32 : i32, i32
  }
}

</mosaic_0001>

<bundles_post_ra>
// kernel: tpu_custom_call.1
= control target key start
LH: loop header
LB: loop body
LE: loop exit
PB: predicated region body
PF: predicated region fallthrough
CT: control target
= control target key end

     0   :  { %10 = vsyncpa [#allocation3], 0  ;;  %s1891_s0 = inlined_call_operand.hbm [shape: bf16[200,128], index: 0, kind: input, shape index: {}]   ;;  %s1892_s1 = inlined_call_operand.hbm [shape: bf16[128,256], index: 1, kind: input, shape index: {}]   ;;  %s1893_s2 = inlined_call_operand.vmem [shape: f32[1,256], index: 2, kind: input, shape index: {}]   ;;  %s1894_s3 = inlined_call_operand.hbm [shape: bf16[256,256], index: 3, kind: input, shape index: {}]   ;;  %s1895_s4 = inlined_call_operand.vmem [shape: f32[1,256], index: 4, kind: input, shape index: {}]   ;;  %s1896_s5 = inlined_call_operand.hbm [shape: f32[200,256], index: 5, kind: output, shape index: {}]  }
   0x1   :  { %11 = vsyncpa [#allocation6], 0 }
   0x2   :  { %12 = vsyncpa [#allocation4], 0  ;;  %s1525_s18 = smov [#allocation5]   ;;  %s1431_s22 = scalar_lea.hbm %s1892_s1, 2048 }
   0x3   :  { %s30_s19 = sshll.u32 %s1525_s18, 4  ;;  %p1432_p0 = scmp.ne.s32.totalorder %s1892_s1, %s1431_s22  ;;  %s31_s19 = int_to_ptr.vmem [resolvable:$true] %s30_s19 }
   0x4   :  { %p1435_p1 = scmp.lt.u32.totalorder %s1431_s22, %s1892_s1 }
   0x6   :  { %p1437_p2 = pnand %p1435_p1, %p1432_p0 }
   0x8   :  { %1440 = shalt.err (!%p1437_p2)
}
   0x9   :  { %s1441_s27 = scalar_lea.vmem %s31_s19, 2048  ;;  %p1446_p4 = scmp.lt.s32.totalorder %s31_s19, %s31_s19 }
   0xa   :  { %p1442_p3 = scmp.ne.s32.totalorder %s31_s19, %s1441_s27  ;;  %p1447_p5 = scmp.lt.s32.totalorder %s1441_s27, %s1441_s27 }
   0xc   :  { %p1448_p6 = por %p1447_p5, %p1446_p4 }
   0xe   :  { %p1449_p7 = pnand %p1448_p6, %p1442_p3 }
  0x10   :  { %1452 = shalt.err (!%p1449_p7)
}
  0x11   :  { %s1526_s28 = smov 128   ;;  %s1527_s29 = smov 8  }
  0x12   :  { %36 = dma.hbm_to_vmem [thread:$0]  %s1892_s1, 2048, %s31_s19, [#allocation6], %s1526_s28, %s1526_s28, %s1527_s29  }
  0x13   :  { %s1528_s7 = smov [#allocation2]   ;;  %s1453_s11 = scalar_lea.hbm %s1891_s0, 1600 }
  0x14   :  { %s18_s8 = sshll.u32 %s1528_s7, 4  ;;  %p1454_p8 = scmp.ne.s32.totalorder %s1891_s0, %s1453_s11  ;;  %s19_s8 = int_to_ptr.vmem [resolvable:$true] %s18_s8 }
  0x15   :  { %p1457_p9 = scmp.lt.u32.totalorder %s1453_s11, %s1891_s0 }
  0x17   :  { %p1459_p10 = pnand %p1457_p9, %p1454_p8 }
  0x19   :  { %1462 = shalt.err (!%p1459_p10)
}
  0x1a   :  { %s1463_s16 = scalar_lea.vmem %s19_s8, 1600  ;;  %p1468_p12 = scmp.lt.s32.totalorder %s19_s8, %s19_s8 }
  0x1b   :  { %p1464_p11 = scmp.ne.s32.totalorder %s19_s8, %s1463_s16  ;;  %p1469_p13 = scmp.lt.s32.totalorder %s1463_s16, %s1463_s16 }
  0x1d   :  { %p1470_p0 = por %p1469_p13, %p1468_p12 }
  0x1f   :  { %p1471_p1 = pnand %p1470_p0, %p1464_p11 }
  0x21   :  { %1474 = shalt.err (!%p1471_p1)
}
  0x22   :  { %s1529_s1 = smov 64   ;;  %s1530_s17 = smov 4  }
  0x23   :  { %24 = dma.hbm_to_vmem [thread:$0]  %s1891_s0, 1600, %s19_s8, [#allocation3], %s1529_s1, %s1529_s1, %s1530_s17  }
  0x24   :  { %s1531_s20 = smov [#allocation7]   ;;  %s1475_s24 = scalar_lea.hbm %s1894_s3, 4096 }
  0x25   :  { %s44_s21 = sshll.u32 %s1531_s20, 4  ;;  %p1476_p2 = scmp.ne.s32.totalorder %s1894_s3, %s1475_s24  ;;  %s45_s21 = int_to_ptr.vmem [resolvable:$true] %s44_s21 }
  0x26   :  { %p1479_p3 = scmp.lt.u32.totalorder %s1475_s24, %s1894_s3 }
  0x28   :  { %p1481_p4 = pnand %p1479_p3, %p1476_p2 }
  0x2a   :  { %1484 = shalt.err (!%p1481_p4)
}
  0x2b   :  { %s1485_s6 = scalar_lea.vmem %s45_s21, 4096  ;;  %p1490_p6 = scmp.lt.s32.totalorder %s45_s21, %s45_s21 }
  0x2c   :  { %p1486_p5 = scmp.ne.s32.totalorder %s45_s21, %s1485_s6  ;;  %p1491_p7 = scmp.lt.s32.totalorder %s1485_s6, %s1485_s6 }
  0x2e   :  { %p1492_p8 = por %p1491_p7, %p1490_p6 }
  0x30   :  { %p1493_p9 = pnand %p1492_p8, %p1486_p5 }
  0x32   :  { %1496 = shalt.err (!%p1493_p9)
}
  0x33   :  { %50 = dma.hbm_to_vmem [thread:$0]  %s1894_s3, 4096, %s45_s21, [#allocation6], %s1526_s28, %s1526_s28, %s1527_s29  }
  0x34   :  { %1519 = dma.done.wait [#allocation3], 1600  }
  0x35   :  { %1520 = vsyncadd [#allocation3], 4294965696 }
  0x36   :  { %1521 = dma.done.wait [#allocation6], 6144  }
  0x37   :  { %1522 = vsyncadd [#allocation6], 4294961152  ;;  %v1532_v0 = vmov 0   ;;  %v1246_v1 = vld [vmem:[#allocation5 + $0x4] ss:$8 sps:$4 sm:$0xff]   ;;  %v1270_v20 = vld [vmem:[#allocation2] sm:$0xff]   ;;  %v106_v62 = vlaneseq }
  0x38   :  { %304 = vmatprep.mubr.bf16.mxu0 %v1532_v0  ;;  %v1248_v2 = vld [vmem:[#allocation5] ss:$8 sps:$4 sm:$0xff]   ;;  %272 = vmatprep.subr.bf16.mxu0 %v1246_v1  ;;  %v1249_v3 = vld [vmem:[#allocation5 + $0x14] ss:$8 sps:$4 sm:$0xff]   ;;  %v1251_v4 = vld [vmem:[#allocation5 + $0x10] ss:$8 sps:$4 sm:$0xff]  }
  0x39   :  { %273 = vmatpush1.bf16.msra.mxu0 %v1248_v2  ;;  %v1252_v5 = vld [vmem:[#allocation5 + $0x24] ss:$8 sps:$4 sm:$0xff]   ;;  %v1254_v6 = vld [vmem:[#allocation5 + $0x20] ss:$8 sps:$4 sm:$0xff]   ;;  %v1255_v7 = vld [vmem:[#allocation5 + $0x34] ss:$8 sps:$4 sm:$0xff]  }
  0x3a   :  { %274 = vmatprep.subr.bf16.mxu0 %v1249_v3  ;;  %v1257_v8 = vld [vmem:[#allocation5 + $0x30] ss:$8 sps:$4 sm:$0xff]   ;;  %v1258_v9 = vld [vmem:[#allocation5 + $0x44] ss:$8 sps:$4 sm:$0xff]   ;;  %v1260_v10 = vld [vmem:[#allocation5 + $0x40] ss:$8 sps:$4 sm:$0xff]  }
  0x3b   :  { %v1261_v11 = vld [vmem:[#allocation5 + $0x54] ss:$8 sps:$4 sm:$0xff]   ;;  %v1263_v12 = vld [vmem:[#allocation5 + $0x50] ss:$8 sps:$4 sm:$0xff]   ;;  %v1264_v13 = vld [vmem:[#allocation5 + $0x64] ss:$8 sps:$4 sm:$0xff]  }
  0x3c   :  { %v1266_v14 = vld [vmem:[#allocation5 + $0x60] ss:$8 sps:$4 sm:$0xff]   ;;  %v1267_v15 = vld [vmem:[#allocation5 + $0x74] ss:$8 sps:$4 sm:$0xff]   ;;  %v1285_v16 = vld [vmem:[#allocation7 + $0x4] ss:$8 sps:$4 sm:$0xff]  }
  0x3d   :  { %275 = vmatpush1.bf16.msra.mxu0 %v1251_v4  ;;  %v1283_v17 = vld [vmem:[#allocation7] ss:$8 sps:$4 sm:$0xff]   ;;  %v1288_v18 = vld [vmem:[#allocation7 + $0x14] ss:$8 sps:$4 sm:$0xff]   ;;  %1203 = vmatprep.subr.bf16.mxu1 %v1285_v16  ;;  %v1269_v19 = vld [vmem:[#allocation5 + $0x70] ss:$8 sps:$4 sm:$0xff]  }
  0x3e   :  { %276 = vmatprep.subr.bf16.mxu0 %v1252_v5  ;;  %1219 = vmatpush1.bf16.msra.mxu1 %v1283_v17  ;;  %v1286_v21 = vld [vmem:[#allocation7 + $0x10] ss:$8 sps:$4 sm:$0xff]   ;;  %v1291_v22 = vld [vmem:[#allocation7 + $0x24] ss:$8 sps:$4 sm:$0xff]   ;;  %v1289_v23 = vld [vmem:[#allocation7 + $0x20] ss:$8 sps:$4 sm:$0xff]  }
  0x3f   :  { %1204 = vmatprep.subr.bf16.mxu1 %v1288_v18  ;;  %v1294_v24 = vld [vmem:[#allocation7 + $0x34] ss:$8 sps:$4 sm:$0xff]   ;;  %v1271_v25 = vld [vmem:[#allocation2 + $0x8] sm:$0xff]   ;;  %v1292_v26 = vld [vmem:[#allocation7 + $0x30] ss:$8 sps:$4 sm:$0xff]   ;;  %v1621_v63 = vshrl.u32 %v106_v62, 7 }
  0x40   :  { %v1297_v27 = vld [vmem:[#allocation7 + $0x44] ss:$8 sps:$4 sm:$0xff]   ;;  %v1295_v28 = vld [vmem:[#allocation7 + $0x40] ss:$8 sps:$4 sm:$0xff]   ;;  %v1300_v29 = vld [vmem:[#allocation7 + $0x54] ss:$8 sps:$4 sm:$0xff]  }
  0x41   :  { %277 = vmatpush1.bf16.msra.mxu0 %v1254_v6  ;;  %v1272_v30 = vld [vmem:[#allocation2 + $0x10] sm:$0xff]   ;;  %v1301_v33 = vld [vmem:[#allocation7 + $0x60] ss:$8 sps:$4 sm:$0xff]   ;;  %v1306_v34 = vld [vmem:[#allocation7 + $0x74] ss:$8 sps:$4 sm:$0xff]   ;;  %v112_v2 = vsub.s32 1, %v1621_v63 }
  0x42   :  { %278 = vmatprep.subr.bf16.mxu0 %v1255_v7  ;;  %1220 = vmatpush1.bf16.msra.mxu1 %v1286_v21  ;;  %v1298_v31 = vld [vmem:[#allocation7 + $0x50] ss:$8 sps:$4 sm:$0xff]   ;;  %v1303_v32 = vld [vmem:[#allocation7 + $0x64] ss:$8 sps:$4 sm:$0xff]   ;;  %v1307_v38 = vld [vmem:[#allocation7 + $0x80] ss:$8 sps:$4 sm:$0xff]  }
  0x43   :  { %1205 = vmatprep.subr.bf16.mxu1 %v1291_v22  ;;  %v1273_v35 = vld [vmem:[#allocation2 + $0x18] sm:$0xff]   ;;  %v1309_v37 = vld [vmem:[#allocation7 + $0x84] ss:$8 sps:$4 sm:$0xff]   ;;  %v1274_v40 = vld [vmem:[#allocation2 + $0x20] sm:$0xff]  }
  0x44   :  { %v1304_v36 = vld [vmem:[#allocation7 + $0x70] ss:$8 sps:$4 sm:$0xff]   ;;  %v1312_v39 = vld [vmem:[#allocation7 + $0x94] ss:$8 sps:$4 sm:$0xff]   ;;  %v1275_v42 = vld [vmem:[#allocation2 + $0x28] sm:$0xff]  }
  0x45   :  { %279 = vmatpush1.bf16.msra.mxu0 %v1257_v8  ;;  %v1310_v41 = vld [vmem:[#allocation7 + $0x90] ss:$8 sps:$4 sm:$0xff]   ;;  %v1278_v45 = vld [vmem:[#allocation2 + $0x40] sm:$0xff]   ;;  %v1279_v46 = vld [vmem:[#allocation2 + $0x48] sm:$0xff]  }
  0x46   :  { %280 = vmatprep.subr.bf16.mxu0 %v1258_v9  ;;  %1221 = vmatpush1.bf16.msra.mxu1 %v1289_v23  ;;  %v1276_v43 = vld [vmem:[#allocation2 + $0x30] sm:$0xff]   ;;  %v1277_v44 = vld [vmem:[#allocation2 + $0x38] sm:$0xff]   ;;  %v1313_v50 = vld [vmem:[#allocation7 + $0xa0] ss:$8 sps:$4 sm:$0xff]  }
  0x47   :  { %1206 = vmatprep.subr.bf16.mxu1 %v1294_v24  ;;  %v1280_v47 = vld [vmem:[#allocation2 + $0x50] sm:$0xff]   ;;  %v1281_v49 = vld [vmem:[#allocation2 + $0x58] sm:$0xff]   ;;  %v1282_v54 = vld [vmem:[#allocation2 + $0x60] ss:$0 sps:$4 sm:$0xff]  }
  0x48   :  { %v1315_v48 = vld [vmem:[#allocation7 + $0xa4] ss:$8 sps:$4 sm:$0xff]   ;;  %v1318_v51 = vld [vmem:[#allocation7 + $0xb4] ss:$8 sps:$4 sm:$0xff]   ;;  %v1316_v52 = vld [vmem:[#allocation7 + $0xb0] ss:$8 sps:$4 sm:$0xff]  }
  0x49   :  { %281 = vmatpush1.bf16.msra.mxu0 %v1260_v10  ;;  %v1321_v53 = vld [vmem:[#allocation7 + $0xc4] ss:$8 sps:$4 sm:$0xff]   ;;  %v1319_v55 = vld [vmem:[#allocation7 + $0xc0] ss:$8 sps:$4 sm:$0xff]   ;;  %v1324_v56 = vld [vmem:[#allocation7 + $0xd4] ss:$8 sps:$4 sm:$0xff]  }
  0x4a   :  { %282 = vmatprep.subr.bf16.mxu0 %v1261_v11  ;;  %1222 = vmatpush1.bf16.msra.mxu1 %v1292_v26  ;;  %v1322_v57 = vld [vmem:[#allocation7 + $0xd0] ss:$8 sps:$4 sm:$0xff]   ;;  %v1327_v58 = vld [vmem:[#allocation7 + $0xe4] ss:$8 sps:$4 sm:$0xff]   ;;  %v1325_v59 = vld [vmem:[#allocation7 + $0xe0] ss:$8 sps:$4 sm:$0xff]  }
  0x4b   :  { %1207 = vmatprep.subr.bf16.mxu1 %v1297_v27  ;;  %v1330_v60 = vld [vmem:[#allocation7 + $0xf4] ss:$8 sps:$4 sm:$0xff]   ;;  %v1328_v61 = vld [vmem:[#allocation7 + $0xf0] ss:$8 sps:$4 sm:$0xff]  }
  0x4c   :  { %v104_v1 = vld [vmem:[%s1893_s2] sm:$0x3] }
  0x4d   :  { %283 = vmatpush1.bf16.msra.mxu0 %v1263_v12  ;;  %v1634_v4 = vrot.slane %v104_v1, %v112_v2 }
  0x4e   :  { %284 = vmatprep.subr.bf16.mxu0 %v1264_v13  ;;  %1223 = vmatpush1.bf16.msra.mxu1 %v1295_v28 }
  0x4f   :  { %1208 = vmatprep.subr.bf16.mxu1 %v1300_v29 }
  0x51   :  { %285 = vmatpush1.bf16.msra.mxu0 %v1266_v14 }
  0x52   :  { %286 = vmatprep.subr.bf16.mxu0 %v1267_v15  ;;  %1224 = vmatpush1.bf16.msra.mxu1 %v1298_v31 }
  0x53   :  { %1209 = vmatprep.subr.bf16.mxu1 %v1303_v32 }
  0x55   :  { %287 = vmatpush1.bf16.msra.mxu0 %v1269_v19 }
  0x56   :  { %913 = vmatprep.subr.bf16.mxu0 %v1285_v16  ;;  %1225 = vmatpush1.bf16.msra.mxu1 %v1301_v33 }
  0x57   :  { %1210 = vmatprep.subr.bf16.mxu1 %v1306_v34 }
  0x58   :  { %305 = vmatmul.mubr.bf16.vlgmr.msra.gmra.mrb[0].mxu0 %v1270_v20 }
  0x59   :  { %314 = vmatprep.mubr.bf16.mxu0 %v1532_v0  ;;  %914 = vmatpush1.bf16.msra.mxu0 %v1283_v17 }
  0x5a   :  { %915 = vmatprep.subr.bf16.mxu0 %v1288_v18  ;;  %1226 = vmatpush1.bf16.msra.mxu1 %v1304_v36 }
  0x5b   :  { %1211 = vmatprep.subr.bf16.mxu1 %v1309_v37 }
  0x5d   :  { %916 = vmatpush1.bf16.msra.mxu0 %v1286_v21 }
  0x5e   :  { %917 = vmatprep.subr.bf16.mxu0 %v1291_v22  ;;  %1227 = vmatpush1.bf16.msra.mxu1 %v1307_v38 }
  0x5f   :  { %1212 = vmatprep.subr.bf16.mxu1 %v1312_v39 }
  0x60   :  { %315 = vmatmul.mubr.bf16.gmra.mrb[4].mxu0 %v1271_v25 }
  0x61   :  { %324 = vmatprep.mubr.bf16.mxu0 %v1532_v0  ;;  %918 = vmatpush1.bf16.msra.mxu0 %v1289_v23 }
  0x62   :  { %919 = vmatprep.subr.bf16.mxu0 %v1294_v24  ;;  %1228 = vmatpush1.bf16.msra.mxu1 %v1310_v41 }
  0x63   :  { %1213 = vmatprep.subr.bf16.mxu1 %v1315_v48 }
  0x65   :  { %920 = vmatpush1.bf16.msra.mxu0 %v1292_v26 }
  0x66   :  { %921 = vmatprep.subr.bf16.mxu0 %v1297_v27  ;;  %1229 = vmatpush1.bf16.msra.mxu1 %v1313_v50 }
  0x67   :  { %1214 = vmatprep.subr.bf16.mxu1 %v1318_v51 }
  0x68   :  { %325 = vmatmul.mubr.bf16.gmra.mrb[8].mxu0 %v1272_v30 }
  0x69   :  { %334 = vmatprep.mubr.bf16.mxu0 %v1532_v0  ;;  %922 = vmatpush1.bf16.msra.mxu0 %v1295_v28 }
  0x6a   :  { %923 = vmatprep.subr.bf16.mxu0 %v1300_v29  ;;  %1230 = vmatpush1.bf16.msra.mxu1 %v1316_v52 }
  0x6b   :  { %1215 = vmatprep.subr.bf16.mxu1 %v1321_v53 }
  0x6d   :  { %924 = vmatpush1.bf16.msra.mxu0 %v1298_v31 }
  0x6e   :  { %925 = vmatprep.subr.bf16.mxu0 %v1303_v32  ;;  %1231 = vmatpush1.bf16.msra.mxu1 %v1319_v55 }
  0x6f   :  { %1216 = vmatprep.subr.bf16.mxu1 %v1324_v56 }
  0x70   :  { %335 = vmatmul.mubr.bf16.gmra.mrb[12].mxu0 %v1273_v35 }
  0x71   :  { %344 = vmatprep.mubr.bf16.mxu0 %v1532_v0  ;;  %926 = vmatpush1.bf16.msra.mxu0 %v1301_v33 }
  0x72   :  { %927 = vmatprep.subr.bf16.mxu0 %v1306_v34  ;;  %1232 = vmatpush1.bf16.msra.mxu1 %v1322_v57 }
  0x73   :  { %1217 = vmatprep.subr.bf16.mxu1 %v1327_v58 }
  0x75   :  { %928 = vmatpush1.bf16.msra.mxu0 %v1304_v36 }
  0x76   :  { %929 = vmatprep.subr.bf16.mxu0 %v1309_v37  ;;  %1233 = vmatpush1.bf16.msra.mxu1 %v1325_v59 }
  0x77   :  { %1218 = vmatprep.subr.bf16.mxu1 %v1330_v60 }
  0x78   :  { %345 = vmatmul.mubr.bf16.gmra.mrb[16].mxu0 %v1274_v40 }
  0x79   :  { %354 = vmatprep.mubr.bf16.mxu0 %v1532_v0  ;;  %930 = vmatpush1.bf16.msra.mxu0 %v1307_v38 }
  0x7a   :  { %931 = vmatprep.subr.bf16.mxu0 %v1312_v39  ;;  %1234 = vmatpush1.bf16.msra.mxu1 %v1328_v61 }
  0x7d   :  { %932 = vmatpush1.bf16.msra.mxu0 %v1310_v41 }
  0x7e   :  { %933 = vmatprep.subr.bf16.mxu0 %v1315_v48 }
  0x80   :  { %355 = vmatmul.mubr.bf16.gmra.mrb[20].mxu0 %v1275_v42 }
  0x81   :  { %364 = vmatprep.mubr.bf16.mxu0 %v1532_v0  ;;  %934 = vmatpush1.bf16.msra.mxu0 %v1313_v50 }
  0x82   :  { %935 = vmatprep.subr.bf16.mxu0 %v1318_v51 }
  0x85   :  { %936 = vmatpush1.bf16.msra.mxu0 %v1316_v52 }
  0x86   :  { %937 = vmatprep.subr.bf16.mxu0 %v1321_v53 }
  0x88   :  { %365 = vmatmul.mubr.bf16.gmra.mrb[24].mxu0 %v1276_v43 }
  0x89   :  { %374 = vmatprep.mubr.bf16.mxu0 %v1532_v0  ;;  %938 = vmatpush1.bf16.msra.mxu0 %v1319_v55 }
  0x8a   :  { %939 = vmatprep.subr.bf16.mxu0 %v1324_v56 }
  0x8d   :  { %940 = vmatpush1.bf16.msra.mxu0 %v1322_v57 }
  0x8e   :  { %941 = vmatprep.subr.bf16.mxu0 %v1327_v58 }
  0x90   :  { %375 = vmatmul.mubr.bf16.gmra.mrb[28].mxu0 %v1277_v44 }
  0x91   :  { %384 = vmatprep.mubr.bf16.mxu0 %v1532_v0  ;;  %942 = vmatpush1.bf16.msra.mxu0 %v1325_v59 }
  0x92   :  { %943 = vmatprep.subr.bf16.mxu0 %v1330_v60 }
  0x95   :  { %944 = vmatpush1.bf16.msra.mxu0 %v1328_v61 }
  0x98   :  { %385 = vmatmul.mubr.bf16.gmra.mrb[32].mxu0 %v1278_v45 }
  0x99   :  { %394 = vmatprep.mubr.bf16.mxu0 %v1532_v0 }
  0xa0   :  { %395 = vmatmul.mubr.bf16.gmra.mrb[36].mxu0 %v1279_v46 }
  0xa1   :  { %404 = vmatprep.mubr.bf16.mxu0 %v1532_v0 }
  0xa8   :  { %405 = vmatmul.mubr.bf16.gmra.mrb[40].mxu0 %v1280_v47 }
  0xa9   :  { %414 = vmatprep.mubr.bf16.mxu0 %v1532_v0 }
  0xb0   :  { %415 = vmatmul.mubr.bf16.gmra.mrb[44].mxu0 %v1281_v49 }
  0xb1   :  { %424 = vmatprep.mubr.bf16.mxu0 %v1532_v0  ;;  %v108_v0 = vsub.s32 0, %v1621_v63 }
  0xb3   :  { %v1630_v3 = vrot.slane %v104_v1, %v108_v0 }
  0xb8   :  { %425 = vmatmul.mubr.bf16.gmra.mrb[48].mxu0 %v1282_v54 }
 0x12b   :  { %v306_v5 = vpop.f32.mrb[0].mxu0 }
 0x12c   :  { %v307_v6 = vadd.f32 %v306_v5, %v1630_v3  ;;  %v308_v7 = vpop.f32.mrb[1].mxu0 }
 0x12d   :  { %v309_v8 = vadd.f32 %v308_v7, %v1634_v4  ;;  %v310_v9 = vpop.f32.mrb[2].mxu0 }
 0x12e   :  { %v483_v10 = vmul.f32 0.70710677, %v307_v6  ;;  %v311_v11 = vadd.f32 %v310_v9, %v1630_v3  ;;  %v312_v12 = vpop.f32.mrb[3].mxu0  ;;  %v433_v38 = vmul.f32 0.5, %v307_v6 }
 0x12f   :  { %v484_v13 = vmul.f32 0.70710677, %v309_v8  ;;  %v313_v14 = vadd.f32 %v312_v12, %v1634_v4  ;;  %v434_v43 = vmul.f32 0.5, %v309_v8 }
 0x130   :  { %1331 = verf.f32 %v483_v10  ;;  %v485_v15 = vmul.f32 0.70710677, %v311_v11  ;;  %v435_v39 = vmul.f32 0.5, %v311_v11 }
 0x131   :  { %1333 = verf.f32 %v484_v13  ;;  %v486_v16 = vmul.f32 0.70710677, %v313_v14  ;;  %v436_v44 = vmul.f32 0.5, %v313_v14 }
 0x132   :  { %1335 = verf.f32 %v485_v15 }
 0x133   :  { %1337 = verf.f32 %v486_v16  ;;  %v316_v17 = vpop.f32.mrb[4].mxu0 }
 0x134   :  { %v317_v18 = vadd.f32 %v316_v17, %v1630_v3  ;;  %v318_v19 = vpop.f32.mrb[5].mxu0 }
 0x135   :  { %v319_v20 = vadd.f32 %v318_v19, %v1634_v4  ;;  %v320_v21 = vpop.f32.mrb[6].mxu0 }
 0x136   :  { %v487_v22 = vmul.f32 0.70710677, %v317_v18  ;;  %v321_v23 = vadd.f32 %v320_v21, %v1630_v3  ;;  %v322_v24 = vpop.f32.mrb[7].mxu0  ;;  %v437_v9 = vmul.f32 0.5, %v317_v18 }
 0x137   :  { %v488_v25 = vmul.f32 0.70710677, %v319_v20  ;;  %v323_v26 = vadd.f32 %v322_v24, %v1634_v4  ;;  %v438_v14 = vmul.f32 0.5, %v319_v20 }
 0x138   :  { %1339 = verf.f32 %v487_v22  ;;  %v489_v27 = vmul.f32 0.70710677, %v321_v23  ;;  %v439_v10 = vmul.f32 0.5, %v321_v23 }
 0x139   :  { %1341 = verf.f32 %v488_v25  ;;  %v490_v28 = vmul.f32 0.70710677, %v323_v26  ;;  %v440_v15 = vmul.f32 0.5, %v323_v26 }
 0x13a   :  { %v1332_v29 = vpop.eup %1331  ;;  %1343 = verf.f32 %v489_v27 }
 0x13b   :  { %v1334_v30 = vpop.eup %1333  ;;  %v583_v31 = vadd.f32 1.0, %v1332_v29  ;;  %1345 = verf.f32 %v490_v28  ;;  %v326_v32 = vpop.f32.mrb[8].mxu0 }
 0x13c   :  { %v1336_v33 = vpop.eup %1335  ;;  %v584_v34 = vadd.f32 1.0, %v1334_v30  ;;  %v1645_v35 = vadd.f32 %v326_v32, %v1630_v3  ;;  %v328_v36 = vpop.f32.mrb[9].mxu0 }
 0x13d   :  { %v1338_v37 = vpop.eup %1337  ;;  %v585_v40 = vadd.f32 1.0, %v1336_v33  ;;  %v1648_v41 = vadd.f32 %v328_v36, %v1634_v4  ;;  %v330_v42 = vpop.f32.mrb[10].mxu0  ;;  %v633_v48 = vmul.f32 %v583_v31, %v433_v38 }
 0x13e   :  { %v586_v45 = vadd.f32 1.0, %v1338_v37  ;;  %v491_v46 = vmul.f32 0.70710677, %v1645_v35  ;;  %v332_v47 = vpop.f32.mrb[11].mxu0  ;;  %v331_v51 = vadd.f32 %v330_v42, %v1630_v3  ;;  %v634_v52 = vmul.f32 %v584_v34, %v434_v43 }
 0x13f   :  { %v635_v49 = vmul.f32 %v585_v40, %v435_v39  ;;  %v492_v50 = vmul.f32 0.70710677, %v1648_v41  ;;  %v1654_v54 = vadd.f32 %v332_v47, %v1634_v4  ;;  %v441_v38 = vmul.f32 0.5, %v1645_v35 }
 0x140   :  { %v636_v53 = vmul.f32 %v586_v45, %v436_v44  ;;  %1347 = verf.f32 %v491_v46  ;;  %v493_v56 = vmul.f32 0.70710677, %v331_v51  ;;  %v442_v39 = vmul.f32 0.5, %v1648_v41 }
 0x141   :  { %v683_v55 = vpack.c.bf16 %v635_v49, %v633_v48  ;;  %1349 = verf.f32 %v492_v50  ;;  %v494_v58 = vmul.f32 0.70710677, %v1654_v54  ;;  %v443_v40 = vmul.f32 0.5, %v331_v51 }
 0x142   :  { %v1340_v57 = vpop.eup %1339  ;;  %v684_v59 = vpack.c.bf16 %v636_v53, %v634_v52  ;;  %1351 = verf.f32 %v493_v56  ;;  %v444_v50 = vmul.f32 0.5, %v1654_v54 }
 0x143   :  { %v1342_v60 = vpop.eup %1341  ;;  %v587_v61 = vadd.f32 1.0, %v1340_v57  ;;  %v336_v62 = vpop.f32.mrb[12].mxu0  ;;  %1353 = verf.f32 %v494_v58 }
 0x144   :  { %v1344_v1 = vpop.eup %1343  ;;  %v588_v5 = vadd.f32 1.0, %v1342_v60  ;;  %v1658_v6 = vadd.f32 %v336_v62, %v1630_v3  ;;  %v338_v7 = vpop.f32.mrb[13].mxu0  ;;  %945 = vmatprep.mubr.bf16.mxu0 %v684_v59 }
 0x145   :  { %v1346_v8 = vpop.eup %1345  ;;  %v589_v11 = vadd.f32 1.0, %v1344_v1  ;;  %v1661_v12 = vadd.f32 %v338_v7, %v1634_v4  ;;  %v340_v13 = vpop.f32.mrb[14].mxu0  ;;  %946 = vmatmul.mubr.bf16.vlgmr.msra.gmra.mrb[52].mxu0 %v683_v55  ;;  %v637_v21 = vmul.f32 %v587_v61, %v437_v9 }
 0x146   :  { %v590_v16 = vadd.f32 1.0, %v1346_v8  ;;  %v495_v17 = vmul.f32 0.70710677, %v1658_v6  ;;  %v342_v19 = vpop.f32.mrb[15].mxu0  ;;  %v341_v25 = vadd.f32 %v340_v13, %v1630_v3  ;;  %v638_v18 = vmul.f32 %v588_v5, %v438_v14 }
 0x147   :  { %v639_v22 = vmul.f32 %v589_v11, %v439_v10  ;;  %v496_v24 = vmul.f32 0.70710677, %v1661_v12  ;;  %v343_v27 = vadd.f32 %v342_v19, %v1634_v4  ;;  %v445_v9 = vmul.f32 0.5, %v1658_v6 }
 0x148   :  { %v640_v23 = vmul.f32 %v590_v16, %v440_v15  ;;  %1355 = verf.f32 %v495_v17  ;;  %v497_v28 = vmul.f32 0.70710677, %v341_v25  ;;  %v446_v15 = vmul.f32 0.5, %v1661_v12 }
 0x149   :  { %1357 = verf.f32 %v496_v24  ;;  %v685_v29 = vpack.c.bf16 %v639_v22, %v637_v21  ;;  %v498_v26 = vmul.f32 0.70710677, %v343_v27  ;;  %v447_v16 = vmul.f32 0.5, %v341_v25 }
 0x14a   :  { %v1348_v20 = vpop.eup %1347  ;;  %v686_v30 = vpack.c.bf16 %v640_v23, %v638_v18  ;;  %1359 = verf.f32 %v497_v28  ;;  %v448_v22 = vmul.f32 0.5, %v343_v27 }
 0x14b   :  { %v1350_v31 = vpop.eup %1349  ;;  %v346_v32 = vpop.f32.mrb[16].mxu0  ;;  %v591_v33 = vadd.f32 1.0, %v1348_v20  ;;  %1361 = verf.f32 %v498_v26 }
 0x14c   :  { %v1668_v34 = vadd.f32 %v346_v32, %v1630_v3  ;;  %v348_v36 = vpop.f32.mrb[17].mxu0  ;;  %955 = vmatprep.mubr.bf16.mxu0 %v686_v30  ;;  %v1352_v37 = vpop.eup %1351  ;;  %v592_v49 = vadd.f32 1.0, %v1350_v31 }
 0x14d   :  { %v1673_v42 = vadd.f32 %v348_v36, %v1634_v4  ;;  %v350_v43 = vpop.f32.mrb[18].mxu0  ;;  %956 = vmatmul.mubr.bf16.gmra.mrb[56].mxu0 %v685_v29  ;;  %v1354_v44 = vpop.eup %1353  ;;  %v593_v45 = vadd.f32 1.0, %v1352_v37  ;;  %v641_v52 = vmul.f32 %v591_v33, %v441_v38 }
 0x14e   :  { %v499_v46 = vmul.f32 0.70710677, %v1668_v34  ;;  %v1677_v47 = vadd.f32 %v350_v43, %v1630_v3  ;;  %v352_v48 = vpop.f32.mrb[19].mxu0  ;;  %v594_v51 = vadd.f32 1.0, %v1354_v44  ;;  %v642_v58 = vmul.f32 %v592_v49, %v442_v39 }
 0x14f   :  { %v500_v35 = vmul.f32 0.70710677, %v1673_v42  ;;  %v1682_v41 = vadd.f32 %v352_v48, %v1634_v4  ;;  %v643_v53 = vmul.f32 %v593_v45, %v443_v40  ;;  %v449_v44 = vmul.f32 0.5, %v1668_v34 }
 0x150   :  { %1363 = verf.f32 %v499_v46  ;;  %v501_v55 = vmul.f32 0.70710677, %v1677_v47  ;;  %v644_v59 = vmul.f32 %v594_v51, %v444_v50  ;;  %v451_v45 = vmul.f32 0.5, %v1677_v47 }
 0x151   :  { %1365 = verf.f32 %v500_v35  ;;  %v502_v56 = vmul.f32 0.70710677, %v1682_v41  ;;  %v687_v60 = vpack.c.bf16 %v643_v53, %v641_v52  ;;  %v450_v50 = vmul.f32 0.5, %v1673_v42 }
 0x152   :  { %v1356_v57 = vpop.eup %1355  ;;  %1367 = verf.f32 %v501_v55  ;;  %v688_v7 = vpack.c.bf16 %v644_v59, %v642_v58  ;;  %v452_v35 = vmul.f32 0.5, %v1682_v41 }
 0x153   :  { %v1358_v54 = vpop.eup %1357  ;;  %1369 = verf.f32 %v502_v56  ;;  %v356_v61 = vpop.f32.mrb[20].mxu0  ;;  %v595_v62 = vadd.f32 1.0, %v1356_v57 }
 0x154   :  { %v1687_v1 = vadd.f32 %v356_v61, %v1630_v3  ;;  %v358_v5 = vpop.f32.mrb[21].mxu0  ;;  %v1360_v8 = vpop.eup %1359  ;;  %v596_v10 = vadd.f32 1.0, %v1358_v54  ;;  %965 = vmatprep.mubr.bf16.mxu1 %v688_v7 }
 0x155   :  { %v1691_v11 = vadd.f32 %v358_v5, %v1634_v4  ;;  %v360_v13 = vpop.f32.mrb[22].mxu0  ;;  %v1362_v14 = vpop.eup %1361  ;;  %v597_v17 = vadd.f32 1.0, %v1360_v8  ;;  %966 = vmatmul.mubr.bf16.vlgmr.msra.gmra.mrb[0].mxu1 %v687_v60  ;;  %v645_v23 = vmul.f32 %v595_v62, %v445_v9 }
 0x156   :  { %v503_v19 = vmul.f32 0.70710677, %v1687_v1  ;;  %v362_v21 = vpop.f32.mrb[23].mxu0  ;;  %v598_v24 = vadd.f32 1.0, %v1362_v14  ;;  %v1697_v6 = vadd.f32 %v360_v13, %v1630_v3  ;;  %v646_v12 = vmul.f32 %v596_v10, %v446_v15 }
 0x157   :  { %v504_v18 = vmul.f32 0.70710677, %v1691_v11  ;;  %v647_v28 = vmul.f32 %v597_v17, %v447_v16  ;;  %v1700_v29 = vadd.f32 %v362_v21, %v1634_v4  ;;  %v453_v13 = vmul.f32 0.5, %v1687_v1 }
 0x158   :  { %1371 = verf.f32 %v503_v19  ;;  %v648_v25 = vmul.f32 %v598_v24, %v448_v22  ;;  %v505_v20 = vmul.f32 0.70710677, %v1697_v6  ;;  %v454_v19 = vmul.f32 0.5, %v1691_v11 }
 0x159   :  { %1373 = verf.f32 %v504_v18  ;;  %v506_v27 = vmul.f32 0.70710677, %v1700_v29  ;;  %v689_v30 = vpack.c.bf16 %v647_v28, %v645_v23  ;;  %v455_v21 = vmul.f32 0.5, %v1697_v6 }
 0x15a   :  { %v1364_v26 = vpop.eup %1363  ;;  %1375 = verf.f32 %v505_v20  ;;  %v690_v36 = vpack.c.bf16 %v648_v25, %v646_v12  ;;  %v456_v23 = vmul.f32 0.5, %v1700_v29 }
 0x15b   :  { %v1366_v31 = vpop.eup %1365  ;;  %v599_v32 = vadd.f32 1.0, %v1364_v26  ;;  %v366_v33 = vpop.f32.mrb[24].mxu0  ;;  %1377 = verf.f32 %v506_v27 }
 0x15c   :  { %v1368_v37 = vpop.eup %1367  ;;  %v600_v38 = vadd.f32 1.0, %v1366_v31  ;;  %v1705_v39 = vadd.f32 %v366_v33, %v1630_v3  ;;  %v368_v40 = vpop.f32.mrb[25].mxu0  ;;  %975 = vmatprep.mubr.bf16.mxu1 %v690_v36 }
 0x15d   :  { %v1370_v43 = vpop.eup %1369  ;;  %v601_v46 = vadd.f32 1.0, %v1368_v37  ;;  %v1710_v48 = vadd.f32 %v368_v40, %v1634_v4  ;;  %v370_v49 = vpop.f32.mrb[26].mxu0  ;;  %v649_v55 = vmul.f32 %v599_v32, %v449_v44  ;;  %976 = vmatmul.mubr.bf16.gmra.mrb[4].mxu1 %v689_v30 }
 0x15e   :  { %v602_v51 = vadd.f32 1.0, %v1370_v43  ;;  %v507_v52 = vmul.f32 0.70710677, %v1705_v39  ;;  %v372_v53 = vpop.f32.mrb[27].mxu0  ;;  %v371_v47 = vadd.f32 %v370_v49, %v1630_v3  ;;  %v650_v57 = vmul.f32 %v600_v38, %v450_v50 }
 0x15f   :  { %v651_v56 = vmul.f32 %v601_v46, %v451_v45  ;;  %v508_v34 = vmul.f32 0.70710677, %v1710_v48  ;;  %v373_v59 = vadd.f32 %v372_v53, %v1634_v4  ;;  %v457_v44 = vmul.f32 0.5, %v1705_v39 }
 0x160   :  { %v652_v58 = vmul.f32 %v602_v51, %v452_v35  ;;  %1379 = verf.f32 %v507_v52  ;;  %v509_v42 = vmul.f32 0.70710677, %v371_v47  ;;  %v458_v35 = vmul.f32 0.5, %v1710_v48 }
 0x161   :  { %1381 = verf.f32 %v508_v34  ;;  %v691_v60 = vpack.c.bf16 %v651_v56, %v649_v55  ;;  %v510_v54 = vmul.f32 0.70710677, %v373_v59  ;;  %v459_v51 = vmul.f32 0.5, %v371_v47 }
 0x162   :  { %v1372_v41 = vpop.eup %1371  ;;  %v692_v61 = vpack.c.bf16 %v652_v58, %v650_v57  ;;  %1383 = verf.f32 %v509_v42  ;;  %v460_v56 = vmul.f32 0.5, %v373_v59 }
 0x163   :  { %v1374_v62 = vpop.eup %1373  ;;  %v376_v5 = vpop.f32.mrb[28].mxu0  ;;  %v603_v7 = vadd.f32 1.0, %v1372_v41  ;;  %1385 = verf.f32 %v510_v54 }
 0x164   :  { %v1719_v8 = vadd.f32 %v376_v5, %v1630_v3  ;;  %v378_v9 = vpop.f32.mrb[29].mxu0  ;;  %985 = vmatprep.mubr.bf16.mxu1 %v692_v61  ;;  %v1376_v10 = vpop.eup %1375  ;;  %v604_v14 = vadd.f32 1.0, %v1374_v62 }
 0x165   :  { %v1723_v15 = vadd.f32 %v378_v9, %v1634_v4  ;;  %v380_v16 = vpop.f32.mrb[30].mxu0  ;;  %v1378_v17 = vpop.eup %1377  ;;  %v605_v22 = vadd.f32 1.0, %v1376_v10  ;;  %986 = vmatmul.mubr.bf16.gmra.mrb[8].mxu1 %v691_v60  ;;  %v653_v25 = vmul.f32 %v603_v7, %v453_v13 }
 0x166   :  { %v511_v24 = vmul.f32 0.70710677, %v1719_v8  ;;  %v382_v18 = vpop.f32.mrb[31].mxu0  ;;  %v606_v28 = vadd.f32 1.0, %v1378_v17  ;;  %v1731_v1 = vadd.f32 %v380_v16, %v1630_v3  ;;  %v654_v6 = vmul.f32 %v604_v14, %v454_v19 }
 0x167   :  { %v512_v12 = vmul.f32 0.70710677, %v1723_v15  ;;  %v655_v20 = vmul.f32 %v605_v22, %v455_v21  ;;  %v1734_v11 = vadd.f32 %v382_v18, %v1634_v4  ;;  %v461_v16 = vmul.f32 0.5, %v1719_v8 }
 0x168   :  { %1387 = verf.f32 %v511_v24  ;;  %v656_v26 = vmul.f32 %v606_v28, %v456_v23  ;;  %v513_v27 = vmul.f32 0.70710677, %v1731_v1  ;;  %v462_v24 = vmul.f32 0.5, %v1723_v15 }
 0x169   :  { %1389 = verf.f32 %v512_v12  ;;  %v514_v29 = vmul.f32 0.70710677, %v1734_v11  ;;  %v693_v31 = vpack.c.bf16 %v655_v20, %v653_v25  ;;  %v463_v18 = vmul.f32 0.5, %v1731_v1 }
 0x16a   :  { %v1380_v30 = vpop.eup %1379  ;;  %1391 = verf.f32 %v513_v27  ;;  %v694_v36 = vpack.c.bf16 %v656_v26, %v654_v6  ;;  %v464_v25 = vmul.f32 0.5, %v1734_v11 }
 0x16b   :  { %v1382_v32 = vpop.eup %1381  ;;  %v386_v33 = vpop.f32.mrb[32].mxu0  ;;  %v607_v37 = vadd.f32 1.0, %v1380_v30  ;;  %1393 = verf.f32 %v514_v29 }
 0x16c   :  { %v1739_v38 = vadd.f32 %v386_v33, %v1630_v3  ;;  %v388_v40 = vpop.f32.mrb[33].mxu0  ;;  %v1384_v43 = vpop.eup %1383  ;;  %v608_v45 = vadd.f32 1.0, %v1382_v32  ;;  %995 = vmatprep.mubr.bf16.mxu1 %v694_v36 }
 0x16d   :  { %v1743_v46 = vadd.f32 %v388_v40, %v1634_v4  ;;  %v390_v49 = vpop.f32.mrb[34].mxu0  ;;  %v1386_v50 = vpop.eup %1385  ;;  %v609_v52 = vadd.f32 1.0, %v1384_v43  ;;  %996 = vmatmul.mubr.bf16.gmra.mrb[12].mxu1 %v693_v31  ;;  %v657_v58 = vmul.f32 %v607_v37, %v457_v44 }
 0x16e   :  { %v515_v53 = vmul.f32 0.70710677, %v1739_v38  ;;  %v392_v55 = vpop.f32.mrb[35].mxu0  ;;  %v610_v34 = vadd.f32 1.0, %v1386_v50  ;;  %v1749_v39 = vadd.f32 %v390_v49, %v1630_v3  ;;  %v658_v48 = vmul.f32 %v608_v45, %v458_v35 }
 0x16f   :  { %v516_v57 = vmul.f32 0.70710677, %v1743_v46  ;;  %v659_v42 = vmul.f32 %v609_v52, %v459_v51  ;;  %v1752_v60 = vadd.f32 %v392_v55, %v1634_v4  ;;  %v465_v49 = vmul.f32 0.5, %v1739_v38 }
 0x170   :  { %1395 = verf.f32 %v515_v53  ;;  %v660_v47 = vmul.f32 %v610_v34, %v460_v56  ;;  %v517_v41 = vmul.f32 0.70710677, %v1749_v39  ;;  %v466_v53 = vmul.f32 0.5, %v1743_v46 }
 0x171   :  { %1397 = verf.f32 %v516_v57  ;;  %v518_v59 = vmul.f32 0.70710677, %v1752_v60  ;;  %v695_v61 = vpack.c.bf16 %v659_v42, %v657_v58  ;;  %v467_v55 = vmul.f32 0.5, %v1749_v39 }
 0x172   :  { %v1388_v54 = vpop.eup %1387  ;;  %1399 = verf.f32 %v517_v41  ;;  %v696_v7 = vpack.c.bf16 %v660_v47, %v658_v48  ;;  %v468_v58 = vmul.f32 0.5, %v1752_v60 }
 0x173   :  { %v1390_v62 = vpop.eup %1389  ;;  %v396_v5 = vpop.f32.mrb[36].mxu0  ;;  %v611_v9 = vadd.f32 1.0, %v1388_v54  ;;  %1401 = verf.f32 %v518_v59 }
 0x174   :  { %v1757_v10 = vadd.f32 %v396_v5, %v1630_v3  ;;  %v398_v13 = vpop.f32.mrb[37].mxu0  ;;  %v1392_v14 = vpop.eup %1391  ;;  %v612_v17 = vadd.f32 1.0, %v1390_v62  ;;  %1005 = vmatprep.mubr.bf16.mxu1 %v696_v7 }
 0x175   :  { %v1761_v19 = vadd.f32 %v398_v13, %v1634_v4  ;;  %v400_v21 = vpop.f32.mrb[38].mxu0  ;;  %v1394_v22 = vpop.eup %1393  ;;  %v613_v23 = vadd.f32 1.0, %v1392_v14  ;;  %1006 = vmatmul.mubr.bf16.gmra.mrb[16].mxu1 %v695_v61  ;;  %v661_v26 = vmul.f32 %v611_v9, %v461_v16 }
 0x176   :  { %v519_v28 = vmul.f32 0.70710677, %v1757_v10  ;;  %v402_v12 = vpop.f32.mrb[39].mxu0  ;;  %v614_v20 = vadd.f32 1.0, %v1394_v22  ;;  %v1769_v6 = vadd.f32 %v400_v21, %v1630_v3  ;;  %v662_v1 = vmul.f32 %v612_v17, %v462_v24 }
 0x177   :  { %v520_v8 = vmul.f32 0.70710677, %v1761_v19  ;;  %v663_v27 = vmul.f32 %v613_v23, %v463_v18  ;;  %v1772_v15 = vadd.f32 %v402_v12, %v1634_v4  ;;  %v469_v21 = vmul.f32 0.5, %v1757_v10 }
 0x178   :  { %1403 = verf.f32 %v519_v28  ;;  %v664_v30 = vmul.f32 %v614_v20, %v464_v25  ;;  %v521_v29 = vmul.f32 0.70710677, %v1769_v6  ;;  %v470_v28 = vmul.f32 0.5, %v1761_v19 }
 0x179   :  { %1405 = verf.f32 %v520_v8  ;;  %v522_v11 = vmul.f32 0.70710677, %v1772_v15  ;;  %v697_v32 = vpack.c.bf16 %v663_v27, %v661_v26  ;;  %v471_v12 = vmul.f32 0.5, %v1769_v6 }
 0x17a   :  { %v1396_v31 = vpop.eup %1395  ;;  %1407 = verf.f32 %v521_v29  ;;  %v698_v37 = vpack.c.bf16 %v664_v30, %v662_v1  ;;  %v472_v26 = vmul.f32 0.5, %v1772_v15 }
 0x17b   :  { %v1398_v33 = vpop.eup %1397  ;;  %v406_v36 = vpop.f32.mrb[40].mxu0  ;;  %v615_v40 = vadd.f32 1.0, %v1396_v31  ;;  %1409 = verf.f32 %v522_v11 }
 0x17c   :  { %v1777_v43 = vadd.f32 %v406_v36, %v1630_v3  ;;  %v408_v44 = vpop.f32.mrb[41].mxu0  ;;  %v1400_v45 = vpop.eup %1399  ;;  %v616_v50 = vadd.f32 1.0, %v1398_v33  ;;  %1015 = vmatprep.mubr.bf16.mxu1 %v698_v37 }
 0x17d   :  { %v1781_v35 = vadd.f32 %v408_v44, %v1634_v4  ;;  %v410_v51 = vpop.f32.mrb[42].mxu0  ;;  %v1402_v52 = vpop.eup %1401  ;;  %v617_v56 = vadd.f32 1.0, %v1400_v45  ;;  %1016 = vmatmul.mubr.bf16.gmra.mrb[20].mxu1 %v697_v32  ;;  %v665_v47 = vmul.f32 %v615_v40, %v465_v49 }
 0x17e   :  { %v523_v34 = vmul.f32 0.70710677, %v1777_v43  ;;  %v412_v57 = vpop.f32.mrb[43].mxu0  ;;  %v618_v42 = vadd.f32 1.0, %v1402_v52  ;;  %v1789_v48 = vadd.f32 %v410_v51, %v1630_v3  ;;  %v666_v39 = vmul.f32 %v616_v50, %v466_v53 }
 0x17f   :  { %v524_v38 = vmul.f32 0.70710677, %v1781_v35  ;;  %v667_v41 = vmul.f32 %v617_v56, %v467_v55  ;;  %v1792_v46 = vadd.f32 %v412_v57, %v1634_v4  ;;  %v473_v56 = vmul.f32 0.5, %v1777_v43 }
 0x180   :  { %1411 = verf.f32 %v523_v34  ;;  %v668_v54 = vmul.f32 %v618_v42, %v468_v58  ;;  %v525_v59 = vmul.f32 0.70710677, %v1789_v48  ;;  %v475_v34 = vmul.f32 0.5, %v1789_v48 }
 0x181   :  { %1413 = verf.f32 %v524_v38  ;;  %v526_v60 = vmul.f32 0.70710677, %v1792_v46  ;;  %v699_v62 = vpack.c.bf16 %v667_v41, %v665_v47  ;;  %v474_v38 = vmul.f32 0.5, %v1781_v35 }
 0x182   :  { %v1404_v61 = vpop.eup %1403  ;;  %1415 = verf.f32 %v525_v59  ;;  %v700_v9 = vpack.c.bf16 %v668_v54, %v666_v39  ;;  %v476_v47 = vmul.f32 0.5, %v1792_v46 }
 0x183   :  { %v1406_v5 = vpop.eup %1405  ;;  %v416_v7 = vpop.f32.mrb[44].mxu0  ;;  %v619_v13 = vadd.f32 1.0, %v1404_v61  ;;  %1417 = verf.f32 %v526_v60 }
 0x184   :  { %v1797_v14 = vadd.f32 %v416_v7, %v1630_v3  ;;  %v418_v16 = vpop.f32.mrb[45].mxu0  ;;  %v1408_v17 = vpop.eup %1407  ;;  %v620_v22 = vadd.f32 1.0, %v1406_v5  ;;  %1025 = vmatprep.mubr.bf16.mxu1 %v700_v9 }
 0x185   :  { %v1801_v24 = vadd.f32 %v418_v16, %v1634_v4  ;;  %v420_v18 = vpop.f32.mrb[46].mxu0  ;;  %v1410_v23 = vpop.eup %1409  ;;  %v621_v25 = vadd.f32 1.0, %v1408_v17  ;;  %1026 = vmatmul.mubr.bf16.gmra.mrb[24].mxu1 %v699_v62  ;;  %v669_v30 = vmul.f32 %v619_v13, %v469_v21 }
 0x186   :  { %v527_v20 = vmul.f32 0.70710677, %v1797_v14  ;;  %v422_v8 = vpop.f32.mrb[47].mxu0  ;;  %v622_v27 = vadd.f32 1.0, %v1410_v23  ;;  %v421_v1 = vadd.f32 %v420_v18, %v1630_v3  ;;  %v670_v19 = vmul.f32 %v620_v22, %v470_v28 }
 0x187   :  { %v528_v10 = vmul.f32 0.70710677, %v1801_v24  ;;  %v671_v29 = vmul.f32 %v621_v25, %v471_v12  ;;  %v423_v31 = vadd.f32 %v422_v8, %v1634_v4  ;;  %v477_v46 = vmul.f32 0.5, %v1797_v14 }
 0x188   :  { %1419 = verf.f32 %v527_v20  ;;  %v672_v11 = vmul.f32 %v622_v27, %v472_v26  ;;  %v529_v6 = vmul.f32 0.70710677, %v421_v1  ;;  %v479_v9 = vmul.f32 0.5, %v421_v1 }
 0x189   :  { %1421 = verf.f32 %v528_v10  ;;  %v530_v33 = vmul.f32 0.70710677, %v423_v31  ;;  %v701_v36 = vpack.c.bf16 %v671_v29, %v669_v30  ;;  %v478_v16 = vmul.f32 0.5, %v1801_v24 }
 0x18a   :  { %v1412_v32 = vpop.eup %1411  ;;  %1423 = verf.f32 %v529_v6  ;;  %v702_v40 = vpack.c.bf16 %v672_v11, %v670_v19  ;;  %v480_v17 = vmul.f32 0.5, %v423_v31  ;;  %v741_v31 = vld [vmem:[%s1895_s4] sm:$0x3]  ;;  %s1533_s4 = smov [#allocation8]  }
 0x18b   :  { %v1414_v37 = vpop.eup %1413  ;;  %v426_v15 = vpop.f32.mrb[48].mxu0  ;;  %v623_v44 = vadd.f32 1.0, %v1412_v32  ;;  %1425 = verf.f32 %v530_v33  ;;  %v1823_v19 = vrot.slane %v741_v31, %v108_v0  ;;  %v1827_v11 = vrot.slane %v741_v31, %v112_v2  ;;  %s1129_s8 = sshll.u32 %s1533_s4, 4  ;;  %s1130_s8 = int_to_ptr.vmem [resolvable:$true] %s1129_s8 }
 0x18c   :  { %v427_v45 = vadd.f32 %v426_v15, %v1630_v3  ;;  %v428_v49 = vpop.f32.mrb[49].mxu0  ;;  %v1416_v50 = vpop.eup %1415  ;;  %v624_v51 = vadd.f32 1.0, %v1414_v37  ;;  %1035 = vmatprep.mubr.bf16.mxu1 %v702_v40  ;;  %s1497_s9 = scalar_lea.vmem %s1130_s8, 6400  ;;  %p1502_p11 = scmp.lt.s32.totalorder %s1130_s8, %s1130_s8 }
 0x18d   :  { %v429_v52 = vadd.f32 %v428_v49, %v1634_v4  ;;  %v430_v53 = vpop.f32.mrb[50].mxu0  ;;  %v1418_v55 = vpop.eup %1417  ;;  %v625_v57 = vadd.f32 1.0, %v1416_v50  ;;  %1036 = vmatmul.mubr.bf16.gmra.mrb[28].mxu1 %v701_v36  ;;  %v673_v39 = vmul.f32 %v623_v44, %v473_v56  ;;  %p1498_p10 = scmp.ne.s32.totalorder %s1130_s8, %s1497_s9  ;;  %p1503_p12 = scmp.lt.s32.totalorder %s1497_s9, %s1497_s9 }
 0x18e   :  { %v531_v58 = vmul.f32 0.70710677, %v427_v45  ;;  %v431_v42 = vpop.f32.mrb[51].mxu0  ;;  %v626_v3 = vadd.f32 1.0, %v1418_v55  ;;  %v674_v4 = vmul.f32 %v624_v51, %v474_v38  ;;  %v481_v1 = vmul.f32 0.5, %v427_v45 }
 0x18f   :  { %v532_v41 = vmul.f32 0.70710677, %v429_v52  ;;  %v675_v54 = vmul.f32 %v625_v57, %v475_v34  ;;  %v482_v26 = vmul.f32 0.5, %v429_v52  ;;  %p1504_p13 = por %p1503_p12, %p1502_p11 }
 0x190   :  { %1427 = verf.f32 %v531_v58  ;;  %v676_v59 = vmul.f32 %v626_v3, %v476_v47 }
 0x191   :  { %1429 = verf.f32 %v532_v41  ;;  %v703_v43 = vpack.c.bf16 %v675_v54, %v673_v39  ;;  %p1505_p0 = pnand %p1504_p13, %p1498_p10 }
 0x192   :  { %v1420_v61 = vpop.eup %1419  ;;  %v704_v48 = vpack.c.bf16 %v676_v59, %v674_v4 }
 0x193   :  { %v1422_v60 = vpop.eup %1421  ;;  %v627_v62 = vadd.f32 1.0, %v1420_v61 }
 0x194   :  { %v1424_v5 = vpop.eup %1423  ;;  %v628_v7 = vadd.f32 1.0, %v1422_v60  ;;  %1045 = vmatprep.mubr.bf16.mxu1 %v704_v48 }
 0x195   :  { %v1426_v35 = vpop.eup %1425  ;;  %v629_v13 = vadd.f32 1.0, %v1424_v5  ;;  %1046 = vmatmul.mubr.bf16.gmra.mrb[32].mxu1 %v703_v43  ;;  %v677_v22 = vmul.f32 %v627_v62, %v477_v46 }
 0x196   :  { %v630_v21 = vadd.f32 1.0, %v1426_v35  ;;  %v678_v23 = vmul.f32 %v628_v7, %v478_v16 }
 0x197   :  { %v679_v18 = vmul.f32 %v629_v13, %v479_v9 }
 0x198   :  { %v680_v28 = vmul.f32 %v630_v21, %v480_v17 }
 0x199   :  { %v705_v25 = vpack.c.bf16 %v679_v18, %v677_v22 }
 0x19a   :  { %v1428_v12 = vpop.eup %1427  ;;  %v706_v8 = vpack.c.bf16 %v680_v28, %v678_v23 }
 0x19b   :  { %v1430_v20 = vpop.eup %1429  ;;  %v631_v10 = vadd.f32 1.0, %v1428_v12 }
 0x19c   :  { %v632_v27 = vadd.f32 1.0, %v1430_v20  ;;  %1055 = vmatprep.mubr.bf16.mxu1 %v706_v8 }
 0x19d   :  { %1056 = vmatmul.mubr.bf16.gmra.mrb[36].mxu1 %v705_v25  ;;  %v681_v24 = vmul.f32 %v631_v10, %v481_v1 }
 0x19e   :  { %v682_v14 = vmul.f32 %v632_v27, %v482_v26 }
 0x19f   :  { %v707_v29 = vpack.c.bf16 %v681_v24, %v681_v24 }
 0x1a0   :  { %v708_v30 = vpack.c.bf16 %v682_v14, %v682_v14 }
 0x1a2   :  { %1065 = vmatprep.mubr.bf16.mxu1 %v708_v30 }
 0x1a5   :  { %1066 = vmatmul.mubr.bf16.gmra.mrb[40].mxu1 %v707_v29 }
 0x218   :  { %v947_v6 = vpop.f32.mrb[52].mxu0 }
 0x219   :  { %v948_v32 = vadd.f32 %v947_v6, %v1823_v19  ;;  %v949_v33 = vpop.f32.mrb[53].mxu0 }
 0x21a   :  { %v950_v36 = vadd.f32 %v949_v33, %v1827_v11  ;;  %v951_v37 = vpop.f32.mrb[54].mxu0 }
 0x21b   :  { %1074 = vst [vmem:[#allocation8] sm:$0xff] %v948_v32  ;;  %v952_v15 = vadd.f32 %v951_v37, %v1823_v19  ;;  %v953_v40 = vpop.f32.mrb[55].mxu0 }
 0x21c   :  { %1075 = vst [vmem:[#allocation8 + $0x8] sm:$0xff] %v950_v36  ;;  %v954_v44 = vadd.f32 %v953_v40, %v1827_v11 }
 0x21d   :  { %1076 = vst [vmem:[#allocation8 + $0x10] sm:$0xff] %v952_v15 }
 0x21e   :  { %1077 = vst [vmem:[#allocation8 + $0x18] sm:$0xff] %v954_v44 }
 0x220   :  { %v957_v0 = vpop.f32.mrb[56].mxu0 }
 0x221   :  { %v958_v63 = vadd.f32 %v957_v0, %v1823_v19  ;;  %v959_v2 = vpop.f32.mrb[57].mxu0 }
 0x222   :  { %v960_v45 = vadd.f32 %v959_v2, %v1827_v11  ;;  %v961_v49 = vpop.f32.mrb[58].mxu0 }
 0x223   :  { %1078 = vst [vmem:[#allocation8 + $0x20] sm:$0xff] %v958_v63  ;;  %v962_v50 = vadd.f32 %v961_v49, %v1823_v19  ;;  %v963_v51 = vpop.f32.mrb[59].mxu0 }
 0x224   :  { %1079 = vst [vmem:[#allocation8 + $0x28] sm:$0xff] %v960_v45  ;;  %v964_v52 = vadd.f32 %v963_v51, %v1827_v11 }
 0x225   :  { %1080 = vst [vmem:[#allocation8 + $0x30] sm:$0xff] %v962_v50 }
 0x226   :  { %1081 = vst [vmem:[#allocation8 + $0x38] sm:$0xff] %v964_v52 }
 0x228   :  { %v967_v53 = vpop.f32.mrb[0].mxu1 }
 0x229   :  { %v968_v55 = vadd.f32 %v967_v53, %v1823_v19  ;;  %v969_v56 = vpop.f32.mrb[1].mxu1 }
 0x22a   :  { %v970_v34 = vadd.f32 %v969_v56, %v1827_v11  ;;  %v971_v57 = vpop.f32.mrb[2].mxu1 }
 0x22b   :  { %1082 = vst [vmem:[#allocation8 + $0x40] sm:$0xff] %v968_v55  ;;  %v972_v58 = vadd.f32 %v971_v57, %v1823_v19  ;;  %v973_v42 = vpop.f32.mrb[3].mxu1 }
 0x22c   :  { %1083 = vst [vmem:[#allocation8 + $0x48] sm:$0xff] %v970_v34  ;;  %v974_v38 = vadd.f32 %v973_v42, %v1827_v11 }
 0x22d   :  { %1084 = vst [vmem:[#allocation8 + $0x50] sm:$0xff] %v972_v58 }
 0x22e   :  { %1085 = vst [vmem:[#allocation8 + $0x58] sm:$0xff] %v974_v38 }
 0x230   :  { %v977_v47 = vpop.f32.mrb[4].mxu1 }
 0x231   :  { %v978_v3 = vadd.f32 %v977_v47, %v1823_v19  ;;  %v979_v41 = vpop.f32.mrb[5].mxu1 }
 0x232   :  { %v980_v39 = vadd.f32 %v979_v41, %v1827_v11  ;;  %v981_v54 = vpop.f32.mrb[6].mxu1 }
 0x233   :  { %1086 = vst [vmem:[#allocation8 + $0x60] sm:$0xff] %v978_v3  ;;  %v982_v4 = vadd.f32 %v981_v54, %v1823_v19  ;;  %v983_v59 = vpop.f32.mrb[7].mxu1 }
 0x234   :  { %1087 = vst [vmem:[#allocation8 + $0x68] sm:$0xff] %v980_v39  ;;  %v984_v61 = vadd.f32 %v983_v59, %v1827_v11 }
 0x235   :  { %1088 = vst [vmem:[#allocation8 + $0x70] sm:$0xff] %v982_v4 }
 0x236   :  { %1089 = vst [vmem:[#allocation8 + $0x78] sm:$0xff] %v984_v61 }
 0x238   :  { %v987_v43 = vpop.f32.mrb[8].mxu1 }
 0x239   :  { %v988_v60 = vadd.f32 %v987_v43, %v1823_v19  ;;  %v989_v48 = vpop.f32.mrb[9].mxu1 }
 0x23a   :  { %v990_v62 = vadd.f32 %v989_v48, %v1827_v11  ;;  %v991_v5 = vpop.f32.mrb[10].mxu1 }
 0x23b   :  { %1090 = vst [vmem:[#allocation8 + $0x80] sm:$0xff] %v988_v60  ;;  %v992_v7 = vadd.f32 %v991_v5, %v1823_v19  ;;  %v993_v35 = vpop.f32.mrb[11].mxu1 }
 0x23c   :  { %1091 = vst [vmem:[#allocation8 + $0x88] sm:$0xff] %v990_v62  ;;  %v994_v46 = vadd.f32 %v993_v35, %v1827_v11 }
 0x23d   :  { %1092 = vst [vmem:[#allocation8 + $0x90] sm:$0xff] %v992_v7 }
 0x23e   :  { %1093 = vst [vmem:[#allocation8 + $0x98] sm:$0xff] %v994_v46 }
 0x240   :  { %v997_v9 = vpop.f32.mrb[12].mxu1 }
 0x241   :  { %v998_v13 = vadd.f32 %v997_v9, %v1823_v19  ;;  %v999_v16 = vpop.f32.mrb[13].mxu1 }
 0x242   :  { %v1000_v17 = vadd.f32 %v999_v16, %v1827_v11  ;;  %v1001_v21 = vpop.f32.mrb[14].mxu1 }
 0x243   :  { %1094 = vst [vmem:[#allocation8 + $0xa0] sm:$0xff] %v998_v13  ;;  %v1002_v22 = vadd.f32 %v1001_v21, %v1823_v19  ;;  %v1003_v18 = vpop.f32.mrb[15].mxu1 }
 0x244   :  { %1095 = vst [vmem:[#allocation8 + $0xa8] sm:$0xff] %v1000_v17  ;;  %v1004_v23 = vadd.f32 %v1003_v18, %v1827_v11 }
 0x245   :  { %1096 = vst [vmem:[#allocation8 + $0xb0] sm:$0xff] %v1002_v22 }
 0x246   :  { %1097 = vst [vmem:[#allocation8 + $0xb8] sm:$0xff] %v1004_v23 }
 0x248   :  { %v1007_v28 = vpop.f32.mrb[16].mxu1 }
 0x249   :  { %v1008_v12 = vadd.f32 %v1007_v28, %v1823_v19  ;;  %v1009_v25 = vpop.f32.mrb[17].mxu1 }
 0x24a   :  { %v1010_v20 = vadd.f32 %v1009_v25, %v1827_v11  ;;  %v1011_v8 = vpop.f32.mrb[18].mxu1 }
 0x24b   :  { %1098 = vst [vmem:[#allocation8 + $0xc0] sm:$0xff] %v1008_v12  ;;  %v1012_v26 = vadd.f32 %v1011_v8, %v1823_v19  ;;  %v1013_v27 = vpop.f32.mrb[19].mxu1 }
 0x24c   :  { %1099 = vst [vmem:[#allocation8 + $0xc8] sm:$0xff] %v1010_v20  ;;  %v1014_v10 = vadd.f32 %v1013_v27, %v1827_v11 }
 0x24d   :  { %1100 = vst [vmem:[#allocation8 + $0xd0] sm:$0xff] %v1012_v26 }
 0x24e   :  { %1101 = vst [vmem:[#allocation8 + $0xd8] sm:$0xff] %v1014_v10 }
 0x250   :  { %v1017_v14 = vpop.f32.mrb[20].mxu1 }
 0x251   :  { %v1018_v1 = vadd.f32 %v1017_v14, %v1823_v19  ;;  %v1019_v30 = vpop.f32.mrb[21].mxu1 }
 0x252   :  { %v1020_v24 = vadd.f32 %v1019_v30, %v1827_v11  ;;  %v1021_v29 = vpop.f32.mrb[22].mxu1 }
 0x253   :  { %1102 = vst [vmem:[#allocation8 + $0xe0] sm:$0xff] %v1018_v1  ;;  %v1022_v31 = vadd.f32 %v1021_v29, %v1823_v19  ;;  %v1023_v6 = vpop.f32.mrb[23].mxu1 }
 0x254   :  { %1103 = vst [vmem:[#allocation8 + $0xe8] sm:$0xff] %v1020_v24  ;;  %v1024_v32 = vadd.f32 %v1023_v6, %v1827_v11 }
 0x255   :  { %1104 = vst [vmem:[#allocation8 + $0xf0] sm:$0xff] %v1022_v31 }
 0x256   :  { %1105 = vst [vmem:[#allocation8 + $0xf8] sm:$0xff] %v1024_v32 }
 0x258   :  { %v1027_v33 = vpop.f32.mrb[24].mxu1 }
 0x259   :  { %v1028_v36 = vadd.f32 %v1027_v33, %v1823_v19  ;;  %v1029_v37 = vpop.f32.mrb[25].mxu1 }
 0x25a   :  { %v1030_v15 = vadd.f32 %v1029_v37, %v1827_v11  ;;  %v1031_v40 = vpop.f32.mrb[26].mxu1 }
 0x25b   :  { %1106 = vst [vmem:[#allocation8 + $0x100] sm:$0xff] %v1028_v36  ;;  %v1032_v44 = vadd.f32 %v1031_v40, %v1823_v19  ;;  %v1033_v0 = vpop.f32.mrb[27].mxu1 }
 0x25c   :  { %1107 = vst [vmem:[#allocation8 + $0x108] sm:$0xff] %v1030_v15  ;;  %v1034_v63 = vadd.f32 %v1033_v0, %v1827_v11 }
 0x25d   :  { %1108 = vst [vmem:[#allocation8 + $0x110] sm:$0xff] %v1032_v44 }
 0x25e   :  { %1109 = vst [vmem:[#allocation8 + $0x118] sm:$0xff] %v1034_v63 }
 0x260   :  { %v1037_v2 = vpop.f32.mrb[28].mxu1 }
 0x261   :  { %v1038_v45 = vadd.f32 %v1037_v2, %v1823_v19  ;;  %v1039_v49 = vpop.f32.mrb[29].mxu1 }
 0x262   :  { %v1040_v50 = vadd.f32 %v1039_v49, %v1827_v11  ;;  %v1041_v51 = vpop.f32.mrb[30].mxu1 }
 0x263   :  { %1110 = vst [vmem:[#allocation8 + $0x120] sm:$0xff] %v1038_v45  ;;  %v1042_v52 = vadd.f32 %v1041_v51, %v1823_v19  ;;  %v1043_v53 = vpop.f32.mrb[31].mxu1 }
 0x264   :  { %1111 = vst [vmem:[#allocation8 + $0x128] sm:$0xff] %v1040_v50  ;;  %v1044_v55 = vadd.f32 %v1043_v53, %v1827_v11 }
 0x265   :  { %1112 = vst [vmem:[#allocation8 + $0x130] sm:$0xff] %v1042_v52 }
 0x266   :  { %1113 = vst [vmem:[#allocation8 + $0x138] sm:$0xff] %v1044_v55 }
 0x268   :  { %v1047_v56 = vpop.f32.mrb[32].mxu1 }
 0x269   :  { %v1048_v34 = vadd.f32 %v1047_v56, %v1823_v19  ;;  %v1049_v57 = vpop.f32.mrb[33].mxu1 }
 0x26a   :  { %v1050_v58 = vadd.f32 %v1049_v57, %v1827_v11  ;;  %v1051_v42 = vpop.f32.mrb[34].mxu1 }
 0x26b   :  { %1114 = vst [vmem:[#allocation8 + $0x140] sm:$0xff] %v1048_v34  ;;  %v1052_v38 = vadd.f32 %v1051_v42, %v1823_v19  ;;  %v1053_v47 = vpop.f32.mrb[35].mxu1 }
 0x26c   :  { %1115 = vst [vmem:[#allocation8 + $0x148] sm:$0xff] %v1050_v58  ;;  %v1054_v3 = vadd.f32 %v1053_v47, %v1827_v11 }
 0x26d   :  { %1116 = vst [vmem:[#allocation8 + $0x150] sm:$0xff] %v1052_v38 }
 0x26e   :  { %1117 = vst [vmem:[#allocation8 + $0x158] sm:$0xff] %v1054_v3 }
 0x270   :  { %v1057_v41 = vpop.f32.mrb[36].mxu1 }
 0x271   :  { %v1058_v39 = vadd.f32 %v1057_v41, %v1823_v19  ;;  %v1059_v54 = vpop.f32.mrb[37].mxu1 }
 0x272   :  { %v1060_v4 = vadd.f32 %v1059_v54, %v1827_v11  ;;  %v1061_v59 = vpop.f32.mrb[38].mxu1 }
 0x273   :  { %1118 = vst [vmem:[#allocation8 + $0x160] sm:$0xff] %v1058_v39  ;;  %v1062_v61 = vadd.f32 %v1061_v59, %v1823_v19  ;;  %v1063_v43 = vpop.f32.mrb[39].mxu1 }
 0x274   :  { %1119 = vst [vmem:[#allocation8 + $0x168] sm:$0xff] %v1060_v4  ;;  %v1064_v60 = vadd.f32 %v1063_v43, %v1827_v11 }
 0x275   :  { %1120 = vst [vmem:[#allocation8 + $0x170] sm:$0xff] %v1062_v61 }
 0x276   :  { %1121 = vst [vmem:[#allocation8 + $0x178] sm:$0xff] %v1064_v60 }
 0x278   :  { %v1067_v48 = vpop.f32.mrb[40].mxu1 }
 0x279   :  { %v1068_v62 = vadd.f32 %v1067_v48, %v1823_v19  ;;  %v1069_v5 = vpop.f32.mrb[41].mxu1 }
 0x27a   :  { %v1070_v7 = vadd.f32 %v1069_v5, %v1827_v11  ;;  %v1071_v35 = vpop.f32.mrb[42].mxu1 }
 0x27b   :  { %1122 = vst [vmem:[#allocation8 + $0x180] sm:$0xff] %v1068_v62  ;;  %v1072_v46 = vpop.f32.mrb[43].mxu1 }
 0x27c   :  { %1123 = vst [vmem:[#allocation8 + $0x188] sm:$0xff] %v1070_v7 }
 0x27d   :  { %1508 = shalt.err (!%p1505_p0)
}
 0x27e   :  { %s1509_s12 = scalar_lea.hbm %s1896_s5, 6400 }
 0x27f   :  { %p1510_p1 = scmp.ne.s32.totalorder %s1896_s5, %s1509_s12  ;;  %p1513_p2 = scmp.lt.u32.totalorder %s1509_s12, %s1896_s5 }
 0x281   :  { %p1515_p3 = pnand %p1513_p2, %p1510_p1 }
 0x283   :  { %1518 = shalt.err (!%p1515_p3)
}
 0x284   :  { %s1534_s1 = smov 256   ;;  %s1535_s17 = smov 16  }
 0x285   :  { %1135 = dma.vmem_to_hbm [thread:$0]  %s1130_s8, 6400, %s1896_s5, [#allocation4], %s1534_s1, %s1534_s1, %s1535_s17  }
 0x286   :  { %1523 = dma.done.wait [#allocation4], 6400  }
 0x287   :  { %1524 = vsyncadd [#allocation4], 4294960896 }
 0x288   :  { %1139 = vsyncpa [#allocation3], 1 }
 0x289   :  { %1140 = vsyncpa [#allocation6], 1 }
 0x28a   :  { %1141 = vsyncpa [#allocation4], 1 }

// kernel: tpu_custom_call.1
= control target key start
LH: loop header
LB: loop body
LE: loop exit
PB: predicated region body
PF: predicated region fallthrough
CT: control target
= control target key end

     0   :  { %10 = vsyncpa [#allocation3], 0  ;;  %s1891_s0 = inlined_call_operand.hbm [shape: bf16[200,128], index: 0, kind: input, shape index: {}]   ;;  %s1892_s1 = inlined_call_operand.hbm [shape: bf16[128,256], index: 1, kind: input, shape index: {}]   ;;  %s1893_s2 = inlined_call_operand.vmem [shape: f32[1,256], index: 2, kind: input, shape index: {}]   ;;  %s1894_s3 = inlined_call_operand.hbm [shape: bf16[256,256], index: 3, kind: input, shape index: {}]   ;;  %s1895_s4 = inlined_call_operand.vmem [shape: f32[1,256], index: 4, kind: input, shape index: {}]   ;;  %s1896_s5 = inlined_call_operand.hbm [shape: f32[200,256], index: 5, kind: output, shape index: {}]  }
   0x1   :  { %11 = vsyncpa [#allocation6], 0 }
   0x2   :  { %12 = vsyncpa [#allocation4], 0  ;;  %s1525_s18 = smov [#allocation5]   ;;  %s1431_s22 = scalar_lea.hbm %s1892_s1, 2048 }
   0x3   :  { %s30_s19 = sshll.u32 %s1525_s18, 4  ;;  %p1432_p0 = scmp.ne.s32.totalorder %s1892_s1, %s1431_s22  ;;  %s31_s19 = int_to_ptr.vmem [resolvable:$true] %s30_s19 }
   0x4   :  { %p1435_p1 = scmp.lt.u32.totalorder %s1431_s22, %s1892_s1 }
   0x6   :  { %p1437_p2 = pnand %p1435_p1, %p1432_p0 }
   0x8   :  { %1440 = shalt.err (!%p1437_p2)
}
   0x9   :  { %s1441_s27 = scalar_lea.vmem %s31_s19, 2048  ;;  %p1446_p4 = scmp.lt.s32.totalorder %s31_s19, %s31_s19 }
   0xa   :  { %p1442_p3 = scmp.ne.s32.totalorder %s31_s19, %s1441_s27  ;;  %p1447_p5 = scmp.lt.s32.totalorder %s1441_s27, %s1441_s27 }
   0xc   :  { %p1448_p6 = por %p1447_p5, %p1446_p4 }
   0xe   :  { %p1449_p7 = pnand %p1448_p6, %p1442_p3 }
  0x10   :  { %1452 = shalt.err (!%p1449_p7)
}
  0x11   :  { %s1526_s28 = smov 128   ;;  %s1527_s29 = smov 8  }
  0x12   :  { %36 = dma.hbm_to_vmem [thread:$0]  %s1892_s1, 2048, %s31_s19, [#allocation6], %s1526_s28, %s1526_s28, %s1527_s29  }
  0x13   :  { %s1528_s7 = smov [#allocation2]   ;;  %s1453_s11 = scalar_lea.hbm %s1891_s0, 1600 }
  0x14   :  { %s18_s8 = sshll.u32 %s1528_s7, 4  ;;  %p1454_p8 = scmp.ne.s32.totalorder %s1891_s0, %s1453_s11  ;;  %s19_s8 = int_to_ptr.vmem [resolvable:$true] %s18_s8 }
  0x15   :  { %p1457_p9 = scmp.lt.u32.totalorder %s1453_s11, %s1891_s0 }
  0x17   :  { %p1459_p10 = pnand %p1457_p9, %p1454_p8 }
  0x19   :  { %1462 = shalt.err (!%p1459_p10)
}
  0x1a   :  { %s1463_s16 = scalar_lea.vmem %s19_s8, 1600  ;;  %p1468_p12 = scmp.lt.s32.totalorder %s19_s8, %s19_s8 }
  0x1b   :  { %p1464_p11 = scmp.ne.s32.totalorder %s19_s8, %s1463_s16  ;;  %p1469_p13 = scmp.lt.s32.totalorder %s1463_s16, %s1463_s16 }
  0x1d   :  { %p1470_p0 = por %p1469_p13, %p1468_p12 }
  0x1f   :  { %p1471_p1 = pnand %p1470_p0, %p1464_p11 }
  0x21   :  { %1474 = shalt.err (!%p1471_p1)
}
  0x22   :  { %s1529_s1 = smov 64   ;;  %s1530_s17 = smov 4  }
  0x23   :  { %24 = dma.hbm_to_vmem [thread:$0]  %s1891_s0, 1600, %s19_s8, [#allocation3], %s1529_s1, %s1529_s1, %s1530_s17  }
  0x24   :  { %s1531_s20 = smov [#allocation7]   ;;  %s1475_s24 = scalar_lea.hbm %s1894_s3, 4096 }
  0x25   :  { %s44_s21 = sshll.u32 %s1531_s20, 4  ;;  %p1476_p2 = scmp.ne.s32.totalorder %s1894_s3, %s1475_s24  ;;  %s45_s21 = int_to_ptr.vmem [resolvable:$true] %s44_s21 }
  0x26   :  { %p1479_p3 = scmp.lt.u32.totalorder %s1475_s24, %s1894_s3 }
  0x28   :  { %p1481_p4 = pnand %p1479_p3, %p1476_p2 }
  0x2a   :  { %1484 = shalt.err (!%p1481_p4)
}
  0x2b   :  { %s1485_s6 = scalar_lea.vmem %s45_s21, 4096  ;;  %p1490_p6 = scmp.lt.s32.totalorder %s45_s21, %s45_s21 }
  0x2c   :  { %p1486_p5 = scmp.ne.s32.totalorder %s45_s21, %s1485_s6  ;;  %p1491_p7 = scmp.lt.s32.totalorder %s1485_s6, %s1485_s6 }
  0x2e   :  { %p1492_p8 = por %p1491_p7, %p1490_p6 }
  0x30   :  { %p1493_p9 = pnand %p1492_p8, %p1486_p5 }
  0x32   :  { %1496 = shalt.err (!%p1493_p9)
}
  0x33   :  { %50 = dma.hbm_to_vmem [thread:$0]  %s1894_s3, 4096, %s45_s21, [#allocation6], %s1526_s28, %s1526_s28, %s1527_s29  }
  0x34   :  { %1519 = dma.done.wait [#allocation3], 1600  }
  0x35   :  { %1520 = vsyncadd [#allocation3], 4294965696 }
  0x36   :  { %1521 = dma.done.wait [#allocation6], 6144  }
  0x37   :  { %1522 = vsyncadd [#allocation6], 4294961152  ;;  %v1532_v0 = vmov 0   ;;  %v1246_v1 = vld [vmem:[#allocation5 + $0x4] ss:$8 sps:$4 sm:$0xff]   ;;  %v1270_v20 = vld [vmem:[#allocation2] sm:$0xff]   ;;  %v106_v62 = vlaneseq }
  0x38   :  { %304 = vmatprep.mubr.bf16.mxu0 %v1532_v0  ;;  %v1248_v2 = vld [vmem:[#allocation5] ss:$8 sps:$4 sm:$0xff]   ;;  %272 = vmatprep.subr.bf16.mxu0 %v1246_v1  ;;  %v1249_v3 = vld [vmem:[#allocation5 + $0x14] ss:$8 sps:$4 sm:$0xff]   ;;  %v1251_v4 = vld [vmem:[#allocation5 + $0x10] ss:$8 sps:$4 sm:$0xff]  }
  0x39   :  { %273 = vmatpush1.bf16.msra.mxu0 %v1248_v2  ;;  %v1252_v5 = vld [vmem:[#allocation5 + $0x24] ss:$8 sps:$4 sm:$0xff]   ;;  %v1254_v6 = vld [vmem:[#allocation5 + $0x20] ss:$8 sps:$4 sm:$0xff]   ;;  %v1255_v7 = vld [vmem:[#allocation5 + $0x34] ss:$8 sps:$4 sm:$0xff]  }
  0x3a   :  { %274 = vmatprep.subr.bf16.mxu0 %v1249_v3  ;;  %v1257_v8 = vld [vmem:[#allocation5 + $0x30] ss:$8 sps:$4 sm:$0xff]   ;;  %v1258_v9 = vld [vmem:[#allocation5 + $0x44] ss:$8 sps:$4 sm:$0xff]   ;;  %v1260_v10 = vld [vmem:[#allocation5 + $0x40] ss:$8 sps:$4 sm:$0xff]  }
  0x3b   :  { %v1261_v11 = vld [vmem:[#allocation5 + $0x54] ss:$8 sps:$4 sm:$0xff]   ;;  %v1263_v12 = vld [vmem:[#allocation5 + $0x50] ss:$8 sps:$4 sm:$0xff]   ;;  %v1264_v13 = vld [vmem:[#allocation5 + $0x64] ss:$8 sps:$4 sm:$0xff]  }
  0x3c   :  { %v1266_v14 = vld [vmem:[#allocation5 + $0x60] ss:$8 sps:$4 sm:$0xff]   ;;  %v1267_v15 = vld [vmem:[#allocation5 + $0x74] ss:$8 sps:$4 sm:$0xff]   ;;  %v1285_v16 = vld [vmem:[#allocation7 + $0x4] ss:$8 sps:$4 sm:$0xff]  }
  0x3d   :  { %275 = vmatpush1.bf16.msra.mxu0 %v1251_v4  ;;  %v1283_v17 = vld [vmem:[#allocation7] ss:$8 sps:$4 sm:$0xff]   ;;  %v1288_v18 = vld [vmem:[#allocation7 + $0x14] ss:$8 sps:$4 sm:$0xff]   ;;  %1203 = vmatprep.subr.bf16.mxu1 %v1285_v16  ;;  %v1269_v19 = vld [vmem:[#allocation5 + $0x70] ss:$8 sps:$4 sm:$0xff]  }
  0x3e   :  { %276 = vmatprep.subr.bf16.mxu0 %v1252_v5  ;;  %1219 = vmatpush1.bf16.msra.mxu1 %v1283_v17  ;;  %v1286_v21 = vld [vmem:[#allocation7 + $0x10] ss:$8 sps:$4 sm:$0xff]   ;;  %v1291_v22 = vld [vmem:[#allocation7 + $0x24] ss:$8 sps:$4 sm:$0xff]   ;;  %v1289_v23 = vld [vmem:[#allocation7 + $0x20] ss:$8 sps:$4 sm:$0xff]  }
  0x3f   :  { %1204 = vmatprep.subr.bf16.mxu1 %v1288_v18  ;;  %v1294_v24 = vld [vmem:[#allocation7 + $0x34] ss:$8 sps:$4 sm:$0xff]   ;;  %v1271_v25 = vld [vmem:[#allocation2 + $0x8] sm:$0xff]   ;;  %v1292_v26 = vld [vmem:[#allocation7 + $0x30] ss:$8 sps:$4 sm:$0xff]   ;;  %v1621_v63 = vshrl.u32 %v106_v62, 7 }
  0x40   :  { %v1297_v27 = vld [vmem:[#allocation7 + $0x44] ss:$8 sps:$4 sm:$0xff]   ;;  %v1295_v28 = vld [vmem:[#allocation7 + $0x40] ss:$8 sps:$4 sm:$0xff]   ;;  %v1300_v29 = vld [vmem:[#allocation7 + $0x54] ss:$8 sps:$4 sm:$0xff]  }
  0x41   :  { %277 = vmatpush1.bf16.msra.mxu0 %v1254_v6  ;;  %v1272_v30 = vld [vmem:[#allocation2 + $0x10] sm:$0xff]   ;;  %v1301_v33 = vld [vmem:[#allocation7 + $0x60] ss:$8 sps:$4 sm:$0xff]   ;;  %v1306_v34 = vld [vmem:[#allocation7 + $0x74] ss:$8 sps:$4 sm:$0xff]   ;;  %v112_v2 = vsub.s32 1, %v1621_v63 }
  0x42   :  { %278 = vmatprep.subr.bf16.mxu0 %v1255_v7  ;;  %1220 = vmatpush1.bf16.msra.mxu1 %v1286_v21  ;;  %v1298_v31 = vld [vmem:[#allocation7 + $0x50] ss:$8 sps:$4 sm:$0xff]   ;;  %v1303_v32 = vld [vmem:[#allocation7 + $0x64] ss:$8 sps:$4 sm:$0xff]   ;;  %v1307_v38 = vld [vmem:[#allocation7 + $0x80] ss:$8 sps:$4 sm:$0xff]  }
  0x43   :  { %1205 = vmatprep.subr.bf16.mxu1 %v1291_v22  ;;  %v1273_v35 = vld [vmem:[#allocation2 + $0x18] sm:$0xff]   ;;  %v1309_v37 = vld [vmem:[#allocation7 + $0x84] ss:$8 sps:$4 sm:$0xff]   ;;  %v1274_v40 = vld [vmem:[#allocation2 + $0x20] sm:$0xff]  }
  0x44   :  { %v1304_v36 = vld [vmem:[#allocation7 + $0x70] ss:$8 sps:$4 sm:$0xff]   ;;  %v1312_v39 = vld [vmem:[#allocation7 + $0x94] ss:$8 sps:$4 sm:$0xff]   ;;  %v1275_v42 = vld [vmem:[#allocation2 + $0x28] sm:$0xff]  }
  0x45   :  { %279 = vmatpush1.bf16.msra.mxu0 %v1257_v8  ;;  %v1310_v41 = vld [vmem:[#allocation7 + $0x90] ss:$8 sps:$4 sm:$0xff]   ;;  %v1278_v45 = vld [vmem:[#allocation2 + $0x40] sm:$0xff]   ;;  %v1279_v46 = vld [vmem:[#allocation2 + $0x48] sm:$0xff]  }
  0x46   :  { %280 = vmatprep.subr.bf16.mxu0 %v1258_v9  ;;  %1221 = vmatpush1.bf16.msra.mxu1 %v1289_v23  ;;  %v1276_v43 = vld [vmem:[#allocation2 + $0x30] sm:$0xff]   ;;  %v1277_v44 = vld [vmem:[#allocation2 + $0x38] sm:$0xff]   ;;  %v1313_v50 = vld [vmem:[#allocation7 + $0xa0] ss:$8 sps:$4 sm:$0xff]  }
  0x47   :  { %1206 = vmatprep.subr.bf16.mxu1 %v1294_v24  ;;  %v1280_v47 = vld [vmem:[#allocation2 + $0x50] sm:$0xff]   ;;  %v1281_v49 = vld [vmem:[#allocation2 + $0x58] sm:$0xff]   ;;  %v1282_v54 = vld [vmem:[#allocation2 + $0x60] ss:$0 sps:$4 sm:$0xff]  }
  0x48   :  { %v1315_v48 = vld [vmem:[#allocation7 + $0xa4] ss:$8 sps:$4 sm:$0xff]   ;;  %v1318_v51 = vld [vmem:[#allocation7 + $0xb4] ss:$8 sps:$4 sm:$0xff]   ;;  %v1316_v52 = vld [vmem:[#allocation7 + $0xb0] ss:$8 sps:$4 sm:$0xff]  }
  0x49   :  { %281 = vmatpush1.bf16.msra.mxu0 %v1260_v10  ;;  %v1321_v53 = vld [vmem:[#allocation7 + $0xc4] ss:$8 sps:$4 sm:$0xff]   ;;  %v1319_v55 = vld [vmem:[#allocation7 + $0xc0] ss:$8 sps:$4 sm:$0xff]   ;;  %v1324_v56 = vld [vmem:[#allocation7 + $0xd4] ss:$8 sps:$4 sm:$0xff]  }
  0x4a   :  { %282 = vmatprep.subr.bf16.mxu0 %v1261_v11  ;;  %1222 = vmatpush1.bf16.msra.mxu1 %v1292_v26  ;;  %v1322_v57 = vld [vmem:[#allocation7 + $0xd0] ss:$8 sps:$4 sm:$0xff]   ;;  %v1327_v58 = vld [vmem:[#allocation7 + $0xe4] ss:$8 sps:$4 sm:$0xff]   ;;  %v1325_v59 = vld [vmem:[#allocation7 + $0xe0] ss:$8 sps:$4 sm:$0xff]  }
  0x4b   :  { %1207 = vmatprep.subr.bf16.mxu1 %v1297_v27  ;;  %v1330_v60 = vld [vmem:[#allocation7 + $0xf4] ss:$8 sps:$4 sm:$0xff]   ;;  %v1328_v61 = vld [vmem:[#allocation7 + $0xf0] ss:$8 sps:$4 sm:$0xff]  }
  0x4c   :  { %v104_v1 = vld [vmem:[%s1893_s2] sm:$0x3] }
  0x4d   :  { %283 = vmatpush1.bf16.msra.mxu0 %v1263_v12  ;;  %v1634_v4 = vrot.slane %v104_v1, %v112_v2 }
  0x4e   :  { %284 = vmatprep.subr.bf16.mxu0 %v1264_v13  ;;  %1223 = vmatpush1.bf16.msra.mxu1 %v1295_v28 }
  0x4f   :  { %1208 = vmatprep.subr.bf16.mxu1 %v1300_v29 }
  0x51   :  { %285 = vmatpush1.bf16.msra.mxu0 %v1266_v14 }
  0x52   :  { %286 = vmatprep.subr.bf16.mxu0 %v1267_v15  ;;  %1224 = vmatpush1.bf16.msra.mxu1 %v1298_v31 }
  0x53   :  { %1209 = vmatprep.subr.bf16.mxu1 %v1303_v32 }
  0x55   :  { %287 = vmatpush1.bf16.msra.mxu0 %v1269_v19 }
  0x56   :  { %913 = vmatprep.subr.bf16.mxu0 %v1285_v16  ;;  %1225 = vmatpush1.bf16.msra.mxu1 %v1301_v33 }
  0x57   :  { %1210 = vmatprep.subr.bf16.mxu1 %v1306_v34 }
  0x58   :  { %305 = vmatmul.mubr.bf16.vlgmr.msra.gmra.mrb[0].mxu0 %v1270_v20 }
  0x59   :  { %314 = vmatprep.mubr.bf16.mxu0 %v1532_v0  ;;  %914 = vmatpush1.bf16.msra.mxu0 %v1283_v17 }
  0x5a   :  { %915 = vmatprep.subr.bf16.mxu0 %v1288_v18  ;;  %1226 = vmatpush1.bf16.msra.mxu1 %v1304_v36 }
  0x5b   :  { %1211 = vmatprep.subr.bf16.mxu1 %v1309_v37 }
  0x5d   :  { %916 = vmatpush1.bf16.msra.mxu0 %v1286_v21 }
  0x5e   :  { %917 = vmatprep.subr.bf16.mxu0 %v1291_v22  ;;  %1227 = vmatpush1.bf16.msra.mxu1 %v1307_v38 }
  0x5f   :  { %1212 = vmatprep.subr.bf16.mxu1 %v1312_v39 }
  0x60   :  { %315 = vmatmul.mubr.bf16.gmra.mrb[4].mxu0 %v1271_v25 }
  0x61   :  { %324 = vmatprep.mubr.bf16.mxu0 %v1532_v0  ;;  %918 = vmatpush1.bf16.msra.mxu0 %v1289_v23 }
  0x62   :  { %919 = vmatprep.subr.bf16.mxu0 %v1294_v24  ;;  %1228 = vmatpush1.bf16.msra.mxu1 %v1310_v41 }
  0x63   :  { %1213 = vmatprep.subr.bf16.mxu1 %v1315_v48 }
  0x65   :  { %920 = vmatpush1.bf16.msra.mxu0 %v1292_v26 }
  0x66   :  { %921 = vmatprep.subr.bf16.mxu0 %v1297_v27  ;;  %1229 = vmatpush1.bf16.msra.mxu1 %v1313_v50 }
  0x67   :  { %1214 = vmatprep.subr.bf16.mxu1 %v1318_v51 }
  0x68   :  { %325 = vmatmul.mubr.bf16.gmra.mrb[8].mxu0 %v1272_v30 }
  0x69   :  { %334 = vmatprep.mubr.bf16.mxu0 %v1532_v0  ;;  %922 = vmatpush1.bf16.msra.mxu0 %v1295_v28 }
  0x6a   :  { %923 = vmatprep.subr.bf16.mxu0 %v1300_v29  ;;  %1230 = vmatpush1.bf16.msra.mxu1 %v1316_v52 }
  0x6b   :  { %1215 = vmatprep.subr.bf16.mxu1 %v1321_v53 }
  0x6d   :  { %924 = vmatpush1.bf16.msra.mxu0 %v1298_v31 }
  0x6e   :  { %925 = vmatprep.subr.bf16.mxu0 %v1303_v32  ;;  %1231 = vmatpush1.bf16.msra.mxu1 %v1319_v55 }
  0x6f   :  { %1216 = vmatprep.subr.bf16.mxu1 %v1324_v56 }
  0x70   :  { %335 = vmatmul.mubr.bf16.gmra.mrb[12].mxu0 %v1273_v35 }
  0x71   :  { %344 = vmatprep.mubr.bf16.mxu0 %v1532_v0  ;;  %926 = vmatpush1.bf16.msra.mxu0 %v1301_v33 }
  0x72   :  { %927 = vmatprep.subr.bf16.mxu0 %v1306_v34  ;;  %1232 = vmatpush1.bf16.msra.mxu1 %v1322_v57 }
  0x73   :  { %1217 = vmatprep.subr.bf16.mxu1 %v1327_v58 }
  0x75   :  { %928 = vmatpush1.bf16.msra.mxu0 %v1304_v36 }
  0x76   :  { %929 = vmatprep.subr.bf16.mxu0 %v1309_v37  ;;  %1233 = vmatpush1.bf16.msra.mxu1 %v1325_v59 }
  0x77   :  { %1218 = vmatprep.subr.bf16.mxu1 %v1330_v60 }
  0x78   :  { %345 = vmatmul.mubr.bf16.gmra.mrb[16].mxu0 %v1274_v40 }
  0x79   :  { %354 = vmatprep.mubr.bf16.mxu0 %v1532_v0  ;;  %930 = vmatpush1.bf16.msra.mxu0 %v1307_v38 }
  0x7a   :  { %931 = vmatprep.subr.bf16.mxu0 %v1312_v39  ;;  %1234 = vmatpush1.bf16.msra.mxu1 %v1328_v61 }
  0x7d   :  { %932 = vmatpush1.bf16.msra.mxu0 %v1310_v41 }
  0x7e   :  { %933 = vmatprep.subr.bf16.mxu0 %v1315_v48 }
  0x80   :  { %355 = vmatmul.mubr.bf16.gmra.mrb[20].mxu0 %v1275_v42 }
  0x81   :  { %364 = vmatprep.mubr.bf16.mxu0 %v1532_v0  ;;  %934 = vmatpush1.bf16.msra.mxu0 %v1313_v50 }
  0x82   :  { %935 = vmatprep.subr.bf16.mxu0 %v1318_v51 }
  0x85   :  { %936 = vmatpush1.bf16.msra.mxu0 %v1316_v52 }
  0x86   :  { %937 = vmatprep.subr.bf16.mxu0 %v1321_v53 }
  0x88   :  { %365 = vmatmul.mubr.bf16.gmra.mrb[24].mxu0 %v1276_v43 }
  0x89   :  { %374 = vmatprep.mubr.bf16.mxu0 %v1532_v0  ;;  %938 = vmatpush1.bf16.msra.mxu0 %v1319_v55 }
  0x8a   :  { %939 = vmatprep.subr.bf16.mxu0 %v1324_v56 }
  0x8d   :  { %940 = vmatpush1.bf16.msra.mxu0 %v1322_v57 }
  0x8e   :  { %941 = vmatprep.subr.bf16.mxu0 %v1327_v58 }
  0x90   :  { %375 = vmatmul.mubr.bf16.gmra.mrb[28].mxu0 %v1277_v44 }
  0x91   :  { %384 = vmatprep.mubr.bf16.mxu0 %v1532_v0  ;;  %942 = vmatpush1.bf16.msra.mxu0 %v1325_v59 }
  0x92   :  { %943 = vmatprep.subr.bf16.mxu0 %v1330_v60 }
  0x95   :  { %944 = vmatpush1.bf16.msra.mxu0 %v1328_v61 }
  0x98   :  { %385 = vmatmul.mubr.bf16.gmra.mrb[32].mxu0 %v1278_v45 }
  0x99   :  { %394 = vmatprep.mubr.bf16.mxu0 %v1532_v0 }
  0xa0   :  { %395 = vmatmul.mubr.bf16.gmra.mrb[36].mxu0 %v1279_v46 }
  0xa1   :  { %404 = vmatprep.mubr.bf16.mxu0 %v1532_v0 }
  0xa8   :  { %405 = vmatmul.mubr.bf16.gmra.mrb[40].mxu0 %v1280_v47 }
  0xa9   :  { %414 = vmatprep.mubr.bf16.mxu0 %v1532_v0 }
  0xb0   :  { %415 = vmatmul.mubr.bf16.gmra.mrb[44].mxu0 %v1281_v49 }
  0xb1   :  { %424 = vmatprep.mubr.bf16.mxu0 %v1532_v0  ;;  %v108_v0 = vsub.s32 0, %v1621_v63 }
  0xb3   :  { %v1630_v3 = vrot.slane %v104_v1, %v108_v0 }
  0xb8   :  { %425 = vmatmul.mubr.bf16.gmra.mrb[48].mxu0 %v1282_v54 }
 0x12b   :  { %v306_v5 = vpop.f32.mrb[0].mxu0 }
 0x12c   :  { %v307_v6 = vadd.f32 %v306_v5, %v1630_v3  ;;  %v308_v7 = vpop.f32.mrb[1].mxu0 }
 0x12d   :  { %v309_v8 = vadd.f32 %v308_v7, %v1634_v4  ;;  %v310_v9 = vpop.f32.mrb[2].mxu0 }
 0x12e   :  { %v483_v10 = vmul.f32 0.70710677, %v307_v6  ;;  %v311_v11 = vadd.f32 %v310_v9, %v1630_v3  ;;  %v312_v12 = vpop.f32.mrb[3].mxu0  ;;  %v433_v38 = vmul.f32 0.5, %v307_v6 }
 0x12f   :  { %v484_v13 = vmul.f32 0.70710677, %v309_v8  ;;  %v313_v14 = vadd.f32 %v312_v12, %v1634_v4  ;;  %v434_v43 = vmul.f32 0.5, %v309_v8 }
 0x130   :  { %1331 = verf.f32 %v483_v10  ;;  %v485_v15 = vmul.f32 0.70710677, %v311_v11  ;;  %v435_v39 = vmul.f32 0.5, %v311_v11 }
 0x131   :  { %1333 = verf.f32 %v484_v13  ;;  %v486_v16 = vmul.f32 0.70710677, %v313_v14  ;;  %v436_v44 = vmul.f32 0.5, %v313_v14 }
 0x132   :  { %1335 = verf.f32 %v485_v15 }
 0x133   :  { %1337 = verf.f32 %v486_v16  ;;  %v316_v17 = vpop.f32.mrb[4].mxu0 }
 0x134   :  { %v317_v18 = vadd.f32 %v316_v17, %v1630_v3  ;;  %v318_v19 = vpop.f32.mrb[5].mxu0 }
 0x135   :  { %v319_v20 = vadd.f32 %v318_v19, %v1634_v4  ;;  %v320_v21 = vpop.f32.mrb[6].mxu0 }
 0x136   :  { %v487_v22 = vmul.f32 0.70710677, %v317_v18  ;;  %v321_v23 = vadd.f32 %v320_v21, %v1630_v3  ;;  %v322_v24 = vpop.f32.mrb[7].mxu0  ;;  %v437_v9 = vmul.f32 0.5, %v317_v18 }
 0x137   :  { %v488_v25 = vmul.f32 0.70710677, %v319_v20  ;;  %v323_v26 = vadd.f32 %v322_v24, %v1634_v4  ;;  %v438_v14 = vmul.f32 0.5, %v319_v20 }
 0x138   :  { %1339 = verf.f32 %v487_v22  ;;  %v489_v27 = vmul.f32 0.70710677, %v321_v23  ;;  %v439_v10 = vmul.f32 0.5, %v321_v23 }
 0x139   :  { %1341 = verf.f32 %v488_v25  ;;  %v490_v28 = vmul.f32 0.70710677, %v323_v26  ;;  %v440_v15 = vmul.f32 0.5, %v323_v26 }
 0x13a   :  { %v1332_v29 = vpop.eup %1331  ;;  %1343 = verf.f32 %v489_v27 }
 0x13b   :  { %v1334_v30 = vpop.eup %1333  ;;  %v583_v31 = vadd.f32 1.0, %v1332_v29  ;;  %1345 = verf.f32 %v490_v28  ;;  %v326_v32 = vpop.f32.mrb[8].mxu0 }
 0x13c   :  { %v1336_v33 = vpop.eup %1335  ;;  %v584_v34 = vadd.f32 1.0, %v1334_v30  ;;  %v1645_v35 = vadd.f32 %v326_v32, %v1630_v3  ;;  %v328_v36 = vpop.f32.mrb[9].mxu0 }
 0x13d   :  { %v1338_v37 = vpop.eup %1337  ;;  %v585_v40 = vadd.f32 1.0, %v1336_v33  ;;  %v1648_v41 = vadd.f32 %v328_v36, %v1634_v4  ;;  %v330_v42 = vpop.f32.mrb[10].mxu0  ;;  %v633_v48 = vmul.f32 %v583_v31, %v433_v38 }
 0x13e   :  { %v586_v45 = vadd.f32 1.0, %v1338_v37  ;;  %v491_v46 = vmul.f32 0.70710677, %v1645_v35  ;;  %v332_v47 = vpop.f32.mrb[11].mxu0  ;;  %v331_v51 = vadd.f32 %v330_v42, %v1630_v3  ;;  %v634_v52 = vmul.f32 %v584_v34, %v434_v43 }
 0x13f   :  { %v635_v49 = vmul.f32 %v585_v40, %v435_v39  ;;  %v492_v50 = vmul.f32 0.70710677, %v1648_v41  ;;  %v1654_v54 = vadd.f32 %v332_v47, %v1634_v4  ;;  %v441_v38 = vmul.f32 0.5, %v1645_v35 }
 0x140   :  { %v636_v53 = vmul.f32 %v586_v45, %v436_v44  ;;  %1347 = verf.f32 %v491_v46  ;;  %v493_v56 = vmul.f32 0.70710677, %v331_v51  ;;  %v442_v39 = vmul.f32 0.5, %v1648_v41 }
 0x141   :  { %v683_v55 = vpack.c.bf16 %v635_v49, %v633_v48  ;;  %1349 = verf.f32 %v492_v50  ;;  %v494_v58 = vmul.f32 0.70710677, %v1654_v54  ;;  %v443_v40 = vmul.f32 0.5, %v331_v51 }
 0x142   :  { %v1340_v57 = vpop.eup %1339  ;;  %v684_v59 = vpack.c.bf16 %v636_v53, %v634_v52  ;;  %1351 = verf.f32 %v493_v56  ;;  %v444_v50 = vmul.f32 0.5, %v1654_v54 }
 0x143   :  { %v1342_v60 = vpop.eup %1341  ;;  %v587_v61 = vadd.f32 1.0, %v1340_v57  ;;  %v336_v62 = vpop.f32.mrb[12].mxu0  ;;  %1353 = verf.f32 %v494_v58 }
 0x144   :  { %v1344_v1 = vpop.eup %1343  ;;  %v588_v5 = vadd.f32 1.0, %v1342_v60  ;;  %v1658_v6 = vadd.f32 %v336_v62, %v1630_v3  ;;  %v338_v7 = vpop.f32.mrb[13].mxu0  ;;  %945 = vmatprep.mubr.bf16.mxu0 %v684_v59 }
 0x145   :  { %v1346_v8 = vpop.eup %1345  ;;  %v589_v11 = vadd.f32 1.0, %v1344_v1  ;;  %v1661_v12 = vadd.f32 %v338_v7, %v1634_v4  ;;  %v340_v13 = vpop.f32.mrb[14].mxu0  ;;  %946 = vmatmul.mubr.bf16.vlgmr.msra.gmra.mrb[52].mxu0 %v683_v55  ;;  %v637_v21 = vmul.f32 %v587_v61, %v437_v9 }
 0x146   :  { %v590_v16 = vadd.f32 1.0, %v1346_v8  ;;  %v495_v17 = vmul.f32 0.70710677, %v1658_v6  ;;  %v342_v19 = vpop.f32.mrb[15].mxu0  ;;  %v341_v25 = vadd.f32 %v340_v13, %v1630_v3  ;;  %v638_v18 = vmul.f32 %v588_v5, %v438_v14 }
 0x147   :  { %v639_v22 = vmul.f32 %v589_v11, %v439_v10  ;;  %v496_v24 = vmul.f32 0.70710677, %v1661_v12  ;;  %v343_v27 = vadd.f32 %v342_v19, %v1634_v4  ;;  %v445_v9 = vmul.f32 0.5, %v1658_v6 }
 0x148   :  { %v640_v23 = vmul.f32 %v590_v16, %v440_v15  ;;  %1355 = verf.f32 %v495_v17  ;;  %v497_v28 = vmul.f32 0.70710677, %v341_v25  ;;  %v446_v15 = vmul.f32 0.5, %v1661_v12 }
 0x149   :  { %1357 = verf.f32 %v496_v24  ;;  %v685_v29 = vpack.c.bf16 %v639_v22, %v637_v21  ;;  %v498_v26 = vmul.f32 0.70710677, %v343_v27  ;;  %v447_v16 = vmul.f32 0.5, %v341_v25 }
 0x14a   :  { %v1348_v20 = vpop.eup %1347  ;;  %v686_v30 = vpack.c.bf16 %v640_v23, %v638_v18  ;;  %1359 = verf.f32 %v497_v28  ;;  %v448_v22 = vmul.f32 0.5, %v343_v27 }
 0x14b   :  { %v1350_v31 = vpop.eup %1349  ;;  %v346_v32 = vpop.f32.mrb[16].mxu0  ;;  %v591_v33 = vadd.f32 1.0, %v1348_v20  ;;  %1361 = verf.f32 %v498_v26 }
 0x14c   :  { %v1668_v34 = vadd.f32 %v346_v32, %v1630_v3  ;;  %v348_v36 = vpop.f32.mrb[17].mxu0  ;;  %955 = vmatprep.mubr.bf16.mxu0 %v686_v30  ;;  %v1352_v37 = vpop.eup %1351  ;;  %v592_v49 = vadd.f32 1.0, %v1350_v31 }
 0x14d   :  { %v1673_v42 = vadd.f32 %v348_v36, %v1634_v4  ;;  %v350_v43 = vpop.f32.mrb[18].mxu0  ;;  %956 = vmatmul.mubr.bf16.gmra.mrb[56].mxu0 %v685_v29  ;;  %v1354_v44 = vpop.eup %1353  ;;  %v593_v45 = vadd.f32 1.0, %v1352_v37  ;;  %v641_v52 = vmul.f32 %v591_v33, %v441_v38 }
 0x14e   :  { %v499_v46 = vmul.f32 0.70710677, %v1668_v34  ;;  %v1677_v47 = vadd.f32 %v350_v43, %v1630_v3  ;;  %v352_v48 = vpop.f32.mrb[19].mxu0  ;;  %v594_v51 = vadd.f32 1.0, %v1354_v44  ;;  %v642_v58 = vmul.f32 %v592_v49, %v442_v39 }
 0x14f   :  { %v500_v35 = vmul.f32 0.70710677, %v1673_v42  ;;  %v1682_v41 = vadd.f32 %v352_v48, %v1634_v4  ;;  %v643_v53 = vmul.f32 %v593_v45, %v443_v40  ;;  %v449_v44 = vmul.f32 0.5, %v1668_v34 }
 0x150   :  { %1363 = verf.f32 %v499_v46  ;;  %v501_v55 = vmul.f32 0.70710677, %v1677_v47  ;;  %v644_v59 = vmul.f32 %v594_v51, %v444_v50  ;;  %v451_v45 = vmul.f32 0.5, %v1677_v47 }
 0x151   :  { %1365 = verf.f32 %v500_v35  ;;  %v502_v56 = vmul.f32 0.70710677, %v1682_v41  ;;  %v687_v60 = vpack.c.bf16 %v643_v53, %v641_v52  ;;  %v450_v50 = vmul.f32 0.5, %v1673_v42 }
 0x152   :  { %v1356_v57 = vpop.eup %1355  ;;  %1367 = verf.f32 %v501_v55  ;;  %v688_v7 = vpack.c.bf16 %v644_v59, %v642_v58  ;;  %v452_v35 = vmul.f32 0.5, %v1682_v41 }
 0x153   :  { %v1358_v54 = vpop.eup %1357  ;;  %1369 = verf.f32 %v502_v56  ;;  %v356_v61 = vpop.f32.mrb[20].mxu0  ;;  %v595_v62 = vadd.f32 1.0, %v1356_v57 }
 0x154   :  { %v1687_v1 = vadd.f32 %v356_v61, %v1630_v3  ;;  %v358_v5 = vpop.f32.mrb[21].mxu0  ;;  %v1360_v8 = vpop.eup %1359  ;;  %v596_v10 = vadd.f32 1.0, %v1358_v54  ;;  %965 = vmatprep.mubr.bf16.mxu1 %v688_v7 }
 0x155   :  { %v1691_v11 = vadd.f32 %v358_v5, %v1634_v4  ;;  %v360_v13 = vpop.f32.mrb[22].mxu0  ;;  %v1362_v14 = vpop.eup %1361  ;;  %v597_v17 = vadd.f32 1.0, %v1360_v8  ;;  %966 = vmatmul.mubr.bf16.vlgmr.msra.gmra.mrb[0].mxu1 %v687_v60  ;;  %v645_v23 = vmul.f32 %v595_v62, %v445_v9 }
 0x156   :  { %v503_v19 = vmul.f32 0.70710677, %v1687_v1  ;;  %v362_v21 = vpop.f32.mrb[23].mxu0  ;;  %v598_v24 = vadd.f32 1.0, %v1362_v14  ;;  %v1697_v6 = vadd.f32 %v360_v13, %v1630_v3  ;;  %v646_v12 = vmul.f32 %v596_v10, %v446_v15 }
 0x157   :  { %v504_v18 = vmul.f32 0.70710677, %v1691_v11  ;;  %v647_v28 = vmul.f32 %v597_v17, %v447_v16  ;;  %v1700_v29 = vadd.f32 %v362_v21, %v1634_v4  ;;  %v453_v13 = vmul.f32 0.5, %v1687_v1 }
 0x158   :  { %1371 = verf.f32 %v503_v19  ;;  %v648_v25 = vmul.f32 %v598_v24, %v448_v22  ;;  %v505_v20 = vmul.f32 0.70710677, %v1697_v6  ;;  %v454_v19 = vmul.f32 0.5, %v1691_v11 }
 0x159   :  { %1373 = verf.f32 %v504_v18  ;;  %v506_v27 = vmul.f32 0.70710677, %v1700_v29  ;;  %v689_v30 = vpack.c.bf16 %v647_v28, %v645_v23  ;;  %v455_v21 = vmul.f32 0.5, %v1697_v6 }
 0x15a   :  { %v1364_v26 = vpop.eup %1363  ;;  %1375 = verf.f32 %v505_v20  ;;  %v690_v36 = vpack.c.bf16 %v648_v25, %v646_v12  ;;  %v456_v23 = vmul.f32 0.5, %v1700_v29 }
 0x15b   :  { %v1366_v31 = vpop.eup %1365  ;;  %v599_v32 = vadd.f32 1.0, %v1364_v26  ;;  %v366_v33 = vpop.f32.mrb[24].mxu0  ;;  %1377 = verf.f32 %v506_v27 }
 0x15c   :  { %v1368_v37 = vpop.eup %1367  ;;  %v600_v38 = vadd.f32 1.0, %v1366_v31  ;;  %v1705_v39 = vadd.f32 %v366_v33, %v1630_v3  ;;  %v368_v40 = vpop.f32.mrb[25].mxu0  ;;  %975 = vmatprep.mubr.bf16.mxu1 %v690_v36 }
 0x15d   :  { %v1370_v43 = vpop.eup %1369  ;;  %v601_v46 = vadd.f32 1.0, %v1368_v37  ;;  %v1710_v48 = vadd.f32 %v368_v40, %v1634_v4  ;;  %v370_v49 = vpop.f32.mrb[26].mxu0  ;;  %v649_v55 = vmul.f32 %v599_v32, %v449_v44  ;;  %976 = vmatmul.mubr.bf16.gmra.mrb[4].mxu1 %v689_v30 }
 0x15e   :  { %v602_v51 = vadd.f32 1.0, %v1370_v43  ;;  %v507_v52 = vmul.f32 0.70710677, %v1705_v39  ;;  %v372_v53 = vpop.f32.mrb[27].mxu0  ;;  %v371_v47 = vadd.f32 %v370_v49, %v1630_v3  ;;  %v650_v57 = vmul.f32 %v600_v38, %v450_v50 }
 0x15f   :  { %v651_v56 = vmul.f32 %v601_v46, %v451_v45  ;;  %v508_v34 = vmul.f32 0.70710677, %v1710_v48  ;;  %v373_v59 = vadd.f32 %v372_v53, %v1634_v4  ;;  %v457_v44 = vmul.f32 0.5, %v1705_v39 }
 0x160   :  { %v652_v58 = vmul.f32 %v602_v51, %v452_v35  ;;  %1379 = verf.f32 %v507_v52  ;;  %v509_v42 = vmul.f32 0.70710677, %v371_v47  ;;  %v458_v35 = vmul.f32 0.5, %v1710_v48 }
 0x161   :  { %1381 = verf.f32 %v508_v34  ;;  %v691_v60 = vpack.c.bf16 %v651_v56, %v649_v55  ;;  %v510_v54 = vmul.f32 0.70710677, %v373_v59  ;;  %v459_v51 = vmul.f32 0.5, %v371_v47 }
 0x162   :  { %v1372_v41 = vpop.eup %1371  ;;  %v692_v61 = vpack.c.bf16 %v652_v58, %v650_v57  ;;  %1383 = verf.f32 %v509_v42  ;;  %v460_v56 = vmul.f32 0.5, %v373_v59 }
 0x163   :  { %v1374_v62 = vpop.eup %1373  ;;  %v376_v5 = vpop.f32.mrb[28].mxu0  ;;  %v603_v7 = vadd.f32 1.0, %v1372_v41  ;;  %1385 = verf.f32 %v510_v54 }
 0x164   :  { %v1719_v8 = vadd.f32 %v376_v5, %v1630_v3  ;;  %v378_v9 = vpop.f32.mrb[29].mxu0  ;;  %985 = vmatprep.mubr.bf16.mxu1 %v692_v61  ;;  %v1376_v10 = vpop.eup %1375  ;;  %v604_v14 = vadd.f32 1.0, %v1374_v62 }
 0x165   :  { %v1723_v15 = vadd.f32 %v378_v9, %v1634_v4  ;;  %v380_v16 = vpop.f32.mrb[30].mxu0  ;;  %v1378_v17 = vpop.eup %1377  ;;  %v605_v22 = vadd.f32 1.0, %v1376_v10  ;;  %986 = vmatmul.mubr.bf16.gmra.mrb[8].mxu1 %v691_v60  ;;  %v653_v25 = vmul.f32 %v603_v7, %v453_v13 }
 0x166   :  { %v511_v24 = vmul.f32 0.70710677, %v1719_v8  ;;  %v382_v18 = vpop.f32.mrb[31].mxu0  ;;  %v606_v28 = vadd.f32 1.0, %v1378_v17  ;;  %v1731_v1 = vadd.f32 %v380_v16, %v1630_v3  ;;  %v654_v6 = vmul.f32 %v604_v14, %v454_v19 }
 0x167   :  { %v512_v12 = vmul.f32 0.70710677, %v1723_v15  ;;  %v655_v20 = vmul.f32 %v605_v22, %v455_v21  ;;  %v1734_v11 = vadd.f32 %v382_v18, %v1634_v4  ;;  %v461_v16 = vmul.f32 0.5, %v1719_v8 }
 0x168   :  { %1387 = verf.f32 %v511_v24  ;;  %v656_v26 = vmul.f32 %v606_v28, %v456_v23  ;;  %v513_v27 = vmul.f32 0.70710677, %v1731_v1  ;;  %v462_v24 = vmul.f32 0.5, %v1723_v15 }
 0x169   :  { %1389 = verf.f32 %v512_v12  ;;  %v514_v29 = vmul.f32 0.70710677, %v1734_v11  ;;  %v693_v31 = vpack.c.bf16 %v655_v20, %v653_v25  ;;  %v463_v18 = vmul.f32 0.5, %v1731_v1 }
 0x16a   :  { %v1380_v30 = vpop.eup %1379  ;;  %1391 = verf.f32 %v513_v27  ;;  %v694_v36 = vpack.c.bf16 %v656_v26, %v654_v6  ;;  %v464_v25 = vmul.f32 0.5, %v1734_v11 }
 0x16b   :  { %v1382_v32 = vpop.eup %1381  ;;  %v386_v33 = vpop.f32.mrb[32].mxu0  ;;  %v607_v37 = vadd.f32 1.0, %v1380_v30  ;;  %1393 = verf.f32 %v514_v29 }
 0x16c   :  { %v1739_v38 = vadd.f32 %v386_v33, %v1630_v3  ;;  %v388_v40 = vpop.f32.mrb[33].mxu0  ;;  %v1384_v43 = vpop.eup %1383  ;;  %v608_v45 = vadd.f32 1.0, %v1382_v32  ;;  %995 = vmatprep.mubr.bf16.mxu1 %v694_v36 }
 0x16d   :  { %v1743_v46 = vadd.f32 %v388_v40, %v1634_v4  ;;  %v390_v49 = vpop.f32.mrb[34].mxu0  ;;  %v1386_v50 = vpop.eup %1385  ;;  %v609_v52 = vadd.f32 1.0, %v1384_v43  ;;  %996 = vmatmul.mubr.bf16.gmra.mrb[12].mxu1 %v693_v31  ;;  %v657_v58 = vmul.f32 %v607_v37, %v457_v44 }
 0x16e   :  { %v515_v53 = vmul.f32 0.70710677, %v1739_v38  ;;  %v392_v55 = vpop.f32.mrb[35].mxu0  ;;  %v610_v34 = vadd.f32 1.0, %v1386_v50  ;;  %v1749_v39 = vadd.f32 %v390_v49, %v1630_v3  ;;  %v658_v48 = vmul.f32 %v608_v45, %v458_v35 }
 0x16f   :  { %v516_v57 = vmul.f32 0.70710677, %v1743_v46  ;;  %v659_v42 = vmul.f32 %v609_v52, %v459_v51  ;;  %v1752_v60 = vadd.f32 %v392_v55, %v1634_v4  ;;  %v465_v49 = vmul.f32 0.5, %v1739_v38 }
 0x170   :  { %1395 = verf.f32 %v515_v53  ;;  %v660_v47 = vmul.f32 %v610_v34, %v460_v56  ;;  %v517_v41 = vmul.f32 0.70710677, %v1749_v39  ;;  %v466_v53 = vmul.f32 0.5, %v1743_v46 }
 0x171   :  { %1397 = verf.f32 %v516_v57  ;;  %v518_v59 = vmul.f32 0.70710677, %v1752_v60  ;;  %v695_v61 = vpack.c.bf16 %v659_v42, %v657_v58  ;;  %v467_v55 = vmul.f32 0.5, %v1749_v39 }
 0x172   :  { %v1388_v54 = vpop.eup %1387  ;;  %1399 = verf.f32 %v517_v41  ;;  %v696_v7 = vpack.c.bf16 %v660_v47, %v658_v48  ;;  %v468_v58 = vmul.f32 0.5, %v1752_v60 }
 0x173   :  { %v1390_v62 = vpop.eup %1389  ;;  %v396_v5 = vpop.f32.mrb[36].mxu0  ;;  %v611_v9 = vadd.f32 1.0, %v1388_v54  ;;  %1401 = verf.f32 %v518_v59 }
 0x174   :  { %v1757_v10 = vadd.f32 %v396_v5, %v1630_v3  ;;  %v398_v13 = vpop.f32.mrb[37].mxu0  ;;  %v1392_v14 = vpop.eup %1391  ;;  %v612_v17 = vadd.f32 1.0, %v1390_v62  ;;  %1005 = vmatprep.mubr.bf16.mxu1 %v696_v7 }
 0x175   :  { %v1761_v19 = vadd.f32 %v398_v13, %v1634_v4  ;;  %v400_v21 = vpop.f32.mrb[38].mxu0  ;;  %v1394_v22 = vpop.eup %1393  ;;  %v613_v23 = vadd.f32 1.0, %v1392_v14  ;;  %1006 = vmatmul.mubr.bf16.gmra.mrb[16].mxu1 %v695_v61  ;;  %v661_v26 = vmul.f32 %v611_v9, %v461_v16 }
 0x176   :  { %v519_v28 = vmul.f32 0.70710677, %v1757_v10  ;;  %v402_v12 = vpop.f32.mrb[39].mxu0  ;;  %v614_v20 = vadd.f32 1.0, %v1394_v22  ;;  %v1769_v6 = vadd.f32 %v400_v21, %v1630_v3  ;;  %v662_v1 = vmul.f32 %v612_v17, %v462_v24 }
 0x177   :  { %v520_v8 = vmul.f32 0.70710677, %v1761_v19  ;;  %v663_v27 = vmul.f32 %v613_v23, %v463_v18  ;;  %v1772_v15 = vadd.f32 %v402_v12, %v1634_v4  ;;  %v469_v21 = vmul.f32 0.5, %v1757_v10 }
 0x178   :  { %1403 = verf.f32 %v519_v28  ;;  %v664_v30 = vmul.f32 %v614_v20, %v464_v25  ;;  %v521_v29 = vmul.f32 0.70710677, %v1769_v6  ;;  %v470_v28 = vmul.f32 0.5, %v1761_v19 }
 0x179   :  { %1405 = verf.f32 %v520_v8  ;;  %v522_v11 = vmul.f32 0.70710677, %v1772_v15  ;;  %v697_v32 = vpack.c.bf16 %v663_v27, %v661_v26  ;;  %v471_v12 = vmul.f32 0.5, %v1769_v6 }
 0x17a   :  { %v1396_v31 = vpop.eup %1395  ;;  %1407 = verf.f32 %v521_v29  ;;  %v698_v37 = vpack.c.bf16 %v664_v30, %v662_v1  ;;  %v472_v26 = vmul.f32 0.5, %v1772_v15 }
 0x17b   :  { %v1398_v33 = vpop.eup %1397  ;;  %v406_v36 = vpop.f32.mrb[40].mxu0  ;;  %v615_v40 = vadd.f32 1.0, %v1396_v31  ;;  %1409 = verf.f32 %v522_v11 }
 0x17c   :  { %v1777_v43 = vadd.f32 %v406_v36, %v1630_v3  ;;  %v408_v44 = vpop.f32.mrb[41].mxu0  ;;  %v1400_v45 = vpop.eup %1399  ;;  %v616_v50 = vadd.f32 1.0, %v1398_v33  ;;  %1015 = vmatprep.mubr.bf16.mxu1 %v698_v37 }
 0x17d   :  { %v1781_v35 = vadd.f32 %v408_v44, %v1634_v4  ;;  %v410_v51 = vpop.f32.mrb[42].mxu0  ;;  %v1402_v52 = vpop.eup %1401  ;;  %v617_v56 = vadd.f32 1.0, %v1400_v45  ;;  %1016 = vmatmul.mubr.bf16.gmra.mrb[20].mxu1 %v697_v32  ;;  %v665_v47 = vmul.f32 %v615_v40, %v465_v49 }
 0x17e   :  { %v523_v34 = vmul.f32 0.70710677, %v1777_v43  ;;  %v412_v57 = vpop.f32.mrb[43].mxu0  ;;  %v618_v42 = vadd.f32 1.0, %v1402_v52  ;;  %v1789_v48 = vadd.f32 %v410_v51, %v1630_v3  ;;  %v666_v39 = vmul.f32 %v616_v50, %v466_v53 }
 0x17f   :  { %v524_v38 = vmul.f32 0.70710677, %v1781_v35  ;;  %v667_v41 = vmul.f32 %v617_v56, %v467_v55  ;;  %v1792_v46 = vadd.f32 %v412_v57, %v1634_v4  ;;  %v473_v56 = vmul.f32 0.5, %v1777_v43 }
 0x180   :  { %1411 = verf.f32 %v523_v34  ;;  %v668_v54 = vmul.f32 %v618_v42, %v468_v58  ;;  %v525_v59 = vmul.f32 0.70710677, %v1789_v48  ;;  %v475_v34 = vmul.f32 0.5, %v1789_v48 }
 0x181   :  { %1413 = verf.f32 %v524_v38  ;;  %v526_v60 = vmul.f32 0.70710677, %v1792_v46  ;;  %v699_v62 = vpack.c.bf16 %v667_v41, %v665_v47  ;;  %v474_v38 = vmul.f32 0.5, %v1781_v35 }
 0x182   :  { %v1404_v61 = vpop.eup %1403  ;;  %1415 = verf.f32 %v525_v59  ;;  %v700_v9 = vpack.c.bf16 %v668_v54, %v666_v39  ;;  %v476_v47 = vmul.f32 0.5, %v1792_v46 }
 0x183   :  { %v1406_v5 = vpop.eup %1405  ;;  %v416_v7 = vpop.f32.mrb[44].mxu0  ;;  %v619_v13 = vadd.f32 1.0, %v1404_v61  ;;  %1417 = verf.f32 %v526_v60 }
 0x184   :  { %v1797_v14 = vadd.f32 %v416_v7, %v1630_v3  ;;  %v418_v16 = vpop.f32.mrb[45].mxu0  ;;  %v1408_v17 = vpop.eup %1407  ;;  %v620_v22 = vadd.f32 1.0, %v1406_v5  ;;  %1025 = vmatprep.mubr.bf16.mxu1 %v700_v9 }
 0x185   :  { %v1801_v24 = vadd.f32 %v418_v16, %v1634_v4  ;;  %v420_v18 = vpop.f32.mrb[46].mxu0  ;;  %v1410_v23 = vpop.eup %1409  ;;  %v621_v25 = vadd.f32 1.0, %v1408_v17  ;;  %1026 = vmatmul.mubr.bf16.gmra.mrb[24].mxu1 %v699_v62  ;;  %v669_v30 = vmul.f32 %v619_v13, %v469_v21 }
 0x186   :  { %v527_v20 = vmul.f32 0.70710677, %v1797_v14  ;;  %v422_v8 = vpop.f32.mrb[47].mxu0  ;;  %v622_v27 = vadd.f32 1.0, %v1410_v23  ;;  %v421_v1 = vadd.f32 %v420_v18, %v1630_v3  ;;  %v670_v19 = vmul.f32 %v620_v22, %v470_v28 }
 0x187   :  { %v528_v10 = vmul.f32 0.70710677, %v1801_v24  ;;  %v671_v29 = vmul.f32 %v621_v25, %v471_v12  ;;  %v423_v31 = vadd.f32 %v422_v8, %v1634_v4  ;;  %v477_v46 = vmul.f32 0.5, %v1797_v14 }
 0x188   :  { %1419 = verf.f32 %v527_v20  ;;  %v672_v11 = vmul.f32 %v622_v27, %v472_v26  ;;  %v529_v6 = vmul.f32 0.70710677, %v421_v1  ;;  %v479_v9 = vmul.f32 0.5, %v421_v1 }
 0x189   :  { %1421 = verf.f32 %v528_v10  ;;  %v530_v33 = vmul.f32 0.70710677, %v423_v31  ;;  %v701_v36 = vpack.c.bf16 %v671_v29, %v669_v30  ;;  %v478_v16 = vmul.f32 0.5, %v1801_v24 }
 0x18a   :  { %v1412_v32 = vpop.eup %1411  ;;  %1423 = verf.f32 %v529_v6  ;;  %v702_v40 = vpack.c.bf16 %v672_v11, %v670_v19  ;;  %v480_v17 = vmul.f32 0.5, %v423_v31  ;;  %v741_v31 = vld [vmem:[%s1895_s4] sm:$0x3]  ;;  %s1533_s4 = smov [#allocation8]  }
 0x18b   :  { %v1414_v37 = vpop.eup %1413  ;;  %v426_v15 = vpop.f32.mrb[48].mxu0  ;;  %v623_v44 = vadd.f32 1.0, %v1412_v32  ;;  %1425 = verf.f32 %v530_v33  ;;  %v1823_v19 = vrot.slane %v741_v31, %v108_v0  ;;  %v1827_v11 = vrot.slane %v741_v31, %v112_v2  ;;  %s1129_s8 = sshll.u32 %s1533_s4, 4  ;;  %s1130_s8 = int_to_ptr.vmem [resolvable:$true] %s1129_s8 }
 0x18c   :  { %v427_v45 = vadd.f32 %v426_v15, %v1630_v3  ;;  %v428_v49 = vpop.f32.mrb[49].mxu0  ;;  %v1416_v50 = vpop.eup %1415  ;;  %v624_v51 = vadd.f32 1.0, %v1414_v37  ;;  %1035 = vmatprep.mubr.bf16.mxu1 %v702_v40  ;;  %s1497_s9 = scalar_lea.vmem %s1130_s8, 6400  ;;  %p1502_p11 = scmp.lt.s32.totalorder %s1130_s8, %s1130_s8 }
 0x18d   :  { %v429_v52 = vadd.f32 %v428_v49, %v1634_v4  ;;  %v430_v53 = vpop.f32.mrb[50].mxu0  ;;  %v1418_v55 = vpop.eup %1417  ;;  %v625_v57 = vadd.f32 1.0, %v1416_v50  ;;  %1036 = vmatmul.mubr.bf16.gmra.mrb[28].mxu1 %v701_v36  ;;  %v673_v39 = vmul.f32 %v623_v44, %v473_v56  ;;  %p1498_p10 = scmp.ne.s32.totalorder %s1130_s8, %s1497_s9  ;;  %p1503_p12 = scmp.lt.s32.totalorder %s1497_s9, %s1497_s9 }
 0x18e   :  { %v531_v58 = vmul.f32 0.70710677, %v427_v45  ;;  %v431_v42 = vpop.f32.mrb[51].mxu0  ;;  %v626_v3 = vadd.f32 1.0, %v1418_v55  ;;  %v674_v4 = vmul.f32 %v624_v51, %v474_v38  ;;  %v481_v1 = vmul.f32 0.5, %v427_v45 }
 0x18f   :  { %v532_v41 = vmul.f32 0.70710677, %v429_v52  ;;  %v675_v54 = vmul.f32 %v625_v57, %v475_v34  ;;  %v482_v26 = vmul.f32 0.5, %v429_v52  ;;  %p1504_p13 = por %p1503_p12, %p1502_p11 }
 0x190   :  { %1427 = verf.f32 %v531_v58  ;;  %v676_v59 = vmul.f32 %v626_v3, %v476_v47 }
 0x191   :  { %1429 = verf.f32 %v532_v41  ;;  %v703_v43 = vpack.c.bf16 %v675_v54, %v673_v39  ;;  %p1505_p0 = pnand %p1504_p13, %p1498_p10 }
 0x192   :  { %v1420_v61 = vpop.eup %1419  ;;  %v704_v48 = vpack.c.bf16 %v676_v59, %v674_v4 }
 0x193   :  { %v1422_v60 = vpop.eup %1421  ;;  %v627_v62 = vadd.f32 1.0, %v1420_v61 }
 0x194   :  { %v1424_v5 = vpop.eup %1423  ;;  %v628_v7 = vadd.f32 1.0, %v1422_v60  ;;  %1045 = vmatprep.mubr.bf16.mxu1 %v704_v48 }
 0x195   :  { %v1426_v35 = vpop.eup %1425  ;;  %v629_v13 = vadd.f32 1.0, %v1424_v5  ;;  %1046 = vmatmul.mubr.bf16.gmra.mrb[32].mxu1 %v703_v43  ;;  %v677_v22 = vmul.f32 %v627_v62, %v477_v46 }
 0x196   :  { %v630_v21 = vadd.f32 1.0, %v1426_v35  ;;  %v678_v23 = vmul.f32 %v628_v7, %v478_v16 }
 0x197   :  { %v679_v18 = vmul.f32 %v629_v13, %v479_v9 }
 0x198   :  { %v680_v28 = vmul.f32 %v630_v21, %v480_v17 }
 0x199   :  { %v705_v25 = vpack.c.bf16 %v679_v18, %v677_v22 }
 0x19a   :  { %v1428_v12 = vpop.eup %1427  ;;  %v706_v8 = vpack.c.bf16 %v680_v28, %v678_v23 }
 0x19b   :  { %v1430_v20 = vpop.eup %1429  ;;  %v631_v10 = vadd.f32 1.0, %v1428_v12 }
 0x19c   :  { %v632_v27 = vadd.f32 1.0, %v1430_v20  ;;  %1055 = vmatprep.mubr.bf16.mxu1 %v706_v8 }
 0x19d   :  { %1056 = vmatmul.mubr.bf16.gmra.mrb[36].mxu1 %v705_v25  ;;  %v681_v24 = vmul.f32 %v631_v10, %v481_v1 }
 0x19e   :  { %v682_v14 = vmul.f32 %v632_v27, %v482_v26 }
 0x19f   :  { %v707_v29 = vpack.c.bf16 %v681_v24, %v681_v24 }
 0x1a0   :  { %v708_v30 = vpack.c.bf16 %v682_v14, %v682_v14 }
 0x1a2   :  { %1065 = vmatprep.mubr.bf16.mxu1 %v708_v30 }
 0x1a5   :  { %1066 = vmatmul.mubr.bf16.gmra.mrb[40].mxu1 %v707_v29 }
 0x218   :  { %v947_v6 = vpop.f32.mrb[52].mxu0 }
 0x219   :  { %v948_v32 = vadd.f32 %v947_v6, %v1823_v19  ;;  %v949_v33 = vpop.f32.mrb[53].mxu0 }
 0x21a   :  { %v950_v36 = vadd.f32 %v949_v33, %v1827_v11  ;;  %v951_v37 = vpop.f32.mrb[54].mxu0 }
 0x21b   :  { %1074 = vst [vmem:[#allocation8] sm:$0xff] %v948_v32  ;;  %v952_v15 = vadd.f32 %v951_v37, %v1823_v19  ;;  %v953_v40 = vpop.f32.mrb[55].mxu0 }
 0x21c   :  { %1075 = vst [vmem:[#allocation8 + $0x8] sm:$0xff] %v950_v36  ;;  %v954_v44 = vadd.f32 %v953_v40, %v1827_v11 }
 0x21d   :  { %1076 = vst [vmem:[#allocation8 + $0x10] sm:$0xff] %v952_v15 }
 0x21e   :  { %1077 = vst [vmem:[#allocation8 + $0x18] sm:$0xff] %v954_v44 }
 0x220   :  { %v957_v0 = vpop.f32.mrb[56].mxu0 }
 0x221   :  { %v958_v63 = vadd.f32 %v957_v0, %v1823_v19  ;;  %v959_v2 = vpop.f32.mrb[57].mxu0 }
 0x222   :  { %v960_v45 = vadd.f32 %v959_v2, %v1827_v11  ;;  %v961_v49 = vpop.f32.mrb[58].mxu0 }
 0x223   :  { %1078 = vst [vmem:[#allocation8 + $0x20] sm:$0xff] %v958_v63  ;;  %v962_v50 = vadd.f32 %v961_v49, %v1823_v19  ;;  %v963_v51 = vpop.f32.mrb[59].mxu0 }
 0x224   :  { %1079 = vst [vmem:[#allocation8 + $0x28] sm:$0xff] %v960_v45  ;;  %v964_v52 = vadd.f32 %v963_v51, %v1827_v11 }
 0x225   :  { %1080 = vst [vmem:[#allocation8 + $0x30] sm:$0xff] %v962_v50 }
 0x226   :  { %1081 = vst [vmem:[#allocation8 + $0x38] sm:$0xff] %v964_v52 }
 0x228   :  { %v967_v53 = vpop.f32.mrb[0].mxu1 }
 0x229   :  { %v968_v55 = vadd.f32 %v967_v53, %v1823_v19  ;;  %v969_v56 = vpop.f32.mrb[1].mxu1 }
 0x22a   :  { %v970_v34 = vadd.f32 %v969_v56, %v1827_v11  ;;  %v971_v57 = vpop.f32.mrb[2].mxu1 }
 0x22b   :  { %1082 = vst [vmem:[#allocation8 + $0x40] sm:$0xff] %v968_v55  ;;  %v972_v58 = vadd.f32 %v971_v57, %v1823_v19  ;;  %v973_v42 = vpop.f32.mrb[3].mxu1 }
 0x22c   :  { %1083 = vst [vmem:[#allocation8 + $0x48] sm:$0xff] %v970_v34  ;;  %v974_v38 = vadd.f32 %v973_v42, %v1827_v11 }
 0x22d   :  { %1084 = vst [vmem:[#allocation8 + $0x50] sm:$0xff] %v972_v58 }
 0x22e   :  { %1085 = vst [vmem:[#allocation8 + $0x58] sm:$0xff] %v974_v38 }
 0x230   :  { %v977_v47 = vpop.f32.mrb[4].mxu1 }
 0x231   :  { %v978_v3 = vadd.f32 %v977_v47, %v1823_v19  ;;  %v979_v41 = vpop.f32.mrb[5].mxu1 }
 0x232   :  { %v980_v39 = vadd.f32 %v979_v41, %v1827_v11  ;;  %v981_v54 = vpop.f32.mrb[6].mxu1 }
 0x233   :  { %1086 = vst [vmem:[#allocation8 + $0x60] sm:$0xff] %v978_v3  ;;  %v982_v4 = vadd.f32 %v981_v54, %v1823_v19  ;;  %v983_v59 = vpop.f32.mrb[7].mxu1 }
 0x234   :  { %1087 = vst [vmem:[#allocation8 + $0x68] sm:$0xff] %v980_v39  ;;  %v984_v61 = vadd.f32 %v983_v59, %v1827_v11 }
 0x235   :  { %1088 = vst [vmem:[#allocation8 + $0x70] sm:$0xff] %v982_v4 }
 0x236   :  { %1089 = vst [vmem:[#allocation8 + $0x78] sm:$0xff] %v984_v61 }
 0x238   :  { %v987_v43 = vpop.f32.mrb[8].mxu1 }
 0x239   :  { %v988_v60 = vadd.f32 %v987_v43, %v1823_v19  ;;  %v989_v48 = vpop.f32.mrb[9].mxu1 }
 0x23a   :  { %v990_v62 = vadd.f32 %v989_v48, %v1827_v11  ;;  %v991_v5 = vpop.f32.mrb[10].mxu1 }
 0x23b   :  { %1090 = vst [vmem:[#allocation8 + $0x80] sm:$0xff] %v988_v60  ;;  %v992_v7 = vadd.f32 %v991_v5, %v1823_v19  ;;  %v993_v35 = vpop.f32.mrb[11].mxu1 }
 0x23c   :  { %1091 = vst [vmem:[#allocation8 + $0x88] sm:$0xff] %v990_v62  ;;  %v994_v46 = vadd.f32 %v993_v35, %v1827_v11 }
 0x23d   :  { %1092 = vst [vmem:[#allocation8 + $0x90] sm:$0xff] %v992_v7 }
 0x23e   :  { %1093 = vst [vmem:[#allocation8 + $0x98] sm:$0xff] %v994_v46 }
 0x240   :  { %v997_v9 = vpop.f32.mrb[12].mxu1 }
 0x241   :  { %v998_v13 = vadd.f32 %v997_v9, %v1823_v19  ;;  %v999_v16 = vpop.f32.mrb[13].mxu1 }
 0x242   :  { %v1000_v17 = vadd.f32 %v999_v16, %v1827_v11  ;;  %v1001_v21 = vpop.f32.mrb[14].mxu1 }
 0x243   :  { %1094 = vst [vmem:[#allocation8 + $0xa0] sm:$0xff] %v998_v13  ;;  %v1002_v22 = vadd.f32 %v1001_v21, %v1823_v19  ;;  %v1003_v18 = vpop.f32.mrb[15].mxu1 }
 0x244   :  { %1095 = vst [vmem:[#allocation8 + $0xa8] sm:$0xff] %v1000_v17  ;;  %v1004_v23 = vadd.f32 %v1003_v18, %v1827_v11 }
 0x245   :  { %1096 = vst [vmem:[#allocation8 + $0xb0] sm:$0xff] %v1002_v22 }
 0x246   :  { %1097 = vst [vmem:[#allocation8 + $0xb8] sm:$0xff] %v1004_v23 }
 0x248   :  { %v1007_v28 = vpop.f32.mrb[16].mxu1 }
 0x249   :  { %v1008_v12 = vadd.f32 %v1007_v28, %v1823_v19  ;;  %v1009_v25 = vpop.f32.mrb[17].mxu1 }
 0x24a   :  { %v1010_v20 = vadd.f32 %v1009_v25, %v1827_v11  ;;  %v1011_v8 = vpop.f32.mrb[18].mxu1 }
 0x24b   :  { %1098 = vst [vmem:[#allocation8 + $0xc0] sm:$0xff] %v1008_v12  ;;  %v1012_v26 = vadd.f32 %v1011_v8, %v1823_v19  ;;  %v1013_v27 = vpop.f32.mrb[19].mxu1 }
 0x24c   :  { %1099 = vst [vmem:[#allocation8 + $0xc8] sm:$0xff] %v1010_v20  ;;  %v1014_v10 = vadd.f32 %v1013_v27, %v1827_v11 }
 0x24d   :  { %1100 = vst [vmem:[#allocation8 + $0xd0] sm:$0xff] %v1012_v26 }
 0x24e   :  { %1101 = vst [vmem:[#allocation8 + $0xd8] sm:$0xff] %v1014_v10 }
 0x250   :  { %v1017_v14 = vpop.f32.mrb[20].mxu1 }
 0x251   :  { %v1018_v1 = vadd.f32 %v1017_v14, %v1823_v19  ;;  %v1019_v30 = vpop.f32.mrb[21].mxu1 }
 0x252   :  { %v1020_v24 = vadd.f32 %v1019_v30, %v1827_v11  ;;  %v1021_v29 = vpop.f32.mrb[22].mxu1 }
 0x253   :  { %1102 = vst [vmem:[#allocation8 + $0xe0] sm:$0xff] %v1018_v1  ;;  %v1022_v31 = vadd.f32 %v1021_v29, %v1823_v19  ;;  %v1023_v6 = vpop.f32.mrb[23].mxu1 }
 0x254   :  { %1103 = vst [vmem:[#allocation8 + $0xe8] sm:$0xff] %v1020_v24  ;;  %v1024_v32 = vadd.f32 %v1023_v6, %v1827_v11 }
 0x255   :  { %1104 = vst [vmem:[#allocation8 + $0xf0] sm:$0xff] %v1022_v31 }
 0x256   :  { %1105 = vst [vmem:[#allocation8 + $0xf8] sm:$0xff] %v1024_v32 }
 0x258   :  { %v1027_v33 = vpop.f32.mrb[24].mxu1 }
 0x259   :  { %v1028_v36 = vadd.f32 %v1027_v33, %v1823_v19  ;;  %v1029_v37 = vpop.f32.mrb[25].mxu1 }
 0x25a   :  { %v1030_v15 = vadd.f32 %v1029_v37, %v1827_v11  ;;  %v1031_v40 = vpop.f32.mrb[26].mxu1 }
 0x25b   :  { %1106 = vst [vmem:[#allocation8 + $0x100] sm:$0xff] %v1028_v36  ;;  %v1032_v44 = vadd.f32 %v1031_v40, %v1823_v19  ;;  %v1033_v0 = vpop.f32.mrb[27].mxu1 }
 0x25c   :  { %1107 = vst [vmem:[#allocation8 + $0x108] sm:$0xff] %v1030_v15  ;;  %v1034_v63 = vadd.f32 %v1033_v0, %v1827_v11 }
 0x25d   :  { %1108 = vst [vmem:[#allocation8 + $0x110] sm:$0xff] %v1032_v44 }
 0x25e   :  { %1109 = vst [vmem:[#allocation8 + $0x118] sm:$0xff] %v1034_v63 }
 0x260   :  { %v1037_v2 = vpop.f32.mrb[28].mxu1 }
 0x261   :  { %v1038_v45 = vadd.f32 %v1037_v2, %v1823_v19  ;;  %v1039_v49 = vpop.f32.mrb[29].mxu1 }
 0x262   :  { %v1040_v50 = vadd.f32 %v1039_v49, %v1827_v11  ;;  %v1041_v51 = vpop.f32.mrb[30].mxu1 }
 0x263   :  { %1110 = vst [vmem:[#allocation8 + $0x120] sm:$0xff] %v1038_v45  ;;  %v1042_v52 = vadd.f32 %v1041_v51, %v1823_v19  ;;  %v1043_v53 = vpop.f32.mrb[31].mxu1 }
 0x264   :  { %1111 = vst [vmem:[#allocation8 + $0x128] sm:$0xff] %v1040_v50  ;;  %v1044_v55 = vadd.f32 %v1043_v53, %v1827_v11 }
 0x265   :  { %1112 = vst [vmem:[#allocation8 + $0x130] sm:$0xff] %v1042_v52 }
 0x266   :  { %1113 = vst [vmem:[#allocation8 + $0x138] sm:$0xff] %v1044_v55 }
 0x268   :  { %v1047_v56 = vpop.f32.mrb[32].mxu1 }
 0x269   :  { %v1048_v34 = vadd.f32 %v1047_v56, %v1823_v19  ;;  %v1049_v57 = vpop.f32.mrb[33].mxu1 }
 0x26a   :  { %v1050_v58 = vadd.f32 %v1049_v57, %v1827_v11  ;;  %v1051_v42 = vpop.f32.mrb[34].mxu1 }
 0x26b   :  { %1114 = vst [vmem:[#allocation8 + $0x140] sm:$0xff] %v1048_v34  ;;  %v1052_v38 = vadd.f32 %v1051_v42, %v1823_v19  ;;  %v1053_v47 = vpop.f32.mrb[35].mxu1 }
 0x26c   :  { %1115 = vst [vmem:[#allocation8 + $0x148] sm:$0xff] %v1050_v58  ;;  %v1054_v3 = vadd.f32 %v1053_v47, %v1827_v11 }
 0x26d   :  { %1116 = vst [vmem:[#allocation8 + $0x150] sm:$0xff] %v1052_v38 }
 0x26e   :  { %1117 = vst [vmem:[#allocation8 + $0x158] sm:$0xff] %v1054_v3 }
 0x270   :  { %v1057_v41 = vpop.f32.mrb[36].mxu1 }
 0x271   :  { %v1058_v39 = vadd.f32 %v1057_v41, %v1823_v19  ;;  %v1059_v54 = vpop.f32.mrb[37].mxu1 }
 0x272   :  { %v1060_v4 = vadd.f32 %v1059_v54, %v1827_v11  ;;  %v1061_v59 = vpop.f32.mrb[38].mxu1 }
 0x273   :  { %1118 = vst [vmem:[#allocation8 + $0x160] sm:$0xff] %v1058_v39  ;;  %v1062_v61 = vadd.f32 %v1061_v59, %v1823_v19  ;;  %v1063_v43 = vpop.f32.mrb[39].mxu1 }
 0x274   :  { %1119 = vst [vmem:[#allocation8 + $0x168] sm:$0xff] %v1060_v4  ;;  %v1064_v60 = vadd.f32 %v1063_v43, %v1827_v11 }
 0x275   :  { %1120 = vst [vmem:[#allocation8 + $0x170] sm:$0xff] %v1062_v61 }
 0x276   :  { %1121 = vst [vmem:[#allocation8 + $0x178] sm:$0xff] %v1064_v60 }
 0x278   :  { %v1067_v48 = vpop.f32.mrb[40].mxu1 }
 0x279   :  { %v1068_v62 = vadd.f32 %v1067_v48, %v1823_v19  ;;  %v1069_v5 = vpop.f32.mrb[41].mxu1 }
 0x27a   :  { %v1070_v7 = vadd.f32 %v1069_v5, %v1827_v11  ;;  %v1071_v35 = vpop.f32.mrb[42].mxu1 }
 0x27b   :  { %1122 = vst [vmem:[#allocation8 + $0x180] sm:$0xff] %v1068_v62  ;;  %v1072_v46 = vpop.f32.mrb[43].mxu1 }
 0x27c   :  { %1123 = vst [vmem:[#allocation8 + $0x188] sm:$0xff] %v1070_v7 }
 0x27d   :  { %1508 = shalt.err (!%p1505_p0)
}
 0x27e   :  { %s1509_s12 = scalar_lea.hbm %s1896_s5, 6400 }
 0x27f   :  { %p1510_p1 = scmp.ne.s32.totalorder %s1896_s5, %s1509_s12  ;;  %p1513_p2 = scmp.lt.u32.totalorder %s1509_s12, %s1896_s5 }
 0x281   :  { %p1515_p3 = pnand %p1513_p2, %p1510_p1 }
 0x283   :  { %1518 = shalt.err (!%p1515_p3)
}
 0x284   :  { %s1534_s1 = smov 256   ;;  %s1535_s17 = smov 16  }
 0x285   :  { %1135 = dma.vmem_to_hbm [thread:$0]  %s1130_s8, 6400, %s1896_s5, [#allocation4], %s1534_s1, %s1534_s1, %s1535_s17  }
 0x286   :  { %1523 = dma.done.wait [#allocation4], 6400  }
 0x287   :  { %1524 = vsyncadd [#allocation4], 4294960896 }
 0x288   :  { %1139 = vsyncpa [#allocation3], 1 }
 0x289   :  { %1140 = vsyncpa [#allocation6], 1 }
 0x28a   :  { %1141 = vsyncpa [#allocation4], 1 }

</bundles_post_ra>
